<compile_context>
chip_gen: v7x
topology: tpu7x:2x2x1
jax: 0.10.0
libtpu: 0.0.40
codegen_flags: <defaults>
</compile_context>

<pallas_src>
import functools

import jax
import jax.numpy as jnp
from jax.experimental import pallas as pl
from jax.experimental.pallas import tpu as pltpu


# ----------------------------------------------------------------------------
# Fused kernel: for each batch tile
#   ctx_cls  = tanh(mean_pool(ctx_emb)  @ W + b)
#   cand_cls = tanh(mean_pool(cand_emb) @ W + b)
#   score    = sum_h(ctx_cls * cand_cls)        (degenerate poly-code attention)
# Grid: (batch tiles [parallel], seq tiles [arbitrary = reduction]).
# ----------------------------------------------------------------------------
def poly_encoder_kernel(ctx_emb_ref, cand_emb_ref, ctx_len_ref, cand_len_ref,
                        w_ref, b_ref, score_ref, ctx_acc, cand_acc):
    j = pl.program_id(1)

    @pl.when(j == 0)
    def _init():
        ctx_acc[...] = jnp.zeros_like(ctx_acc)
        cand_acc[...] = jnp.zeros_like(cand_acc)

    # Partial sums over this sequence tile.  Embeddings arrive pre-masked
    # (mask is 0/1 so the bf16 product is exact); accumulate in f32.
    ctx_acc[...] += jnp.sum(ctx_emb_ref[...].astype(jnp.float32), axis=1)    # [tb, H]
    cand_acc[...] += jnp.sum(cand_emb_ref[...].astype(jnp.float32), axis=1)  # [tb, H]

    @pl.when(j == pl.num_programs(1) - 1)
    def _finalize():
        tb = ctx_acc.shape[0]
        # Mean pool: clamp + EUP approximate reciprocal (free slot vs VPU divide).
        inv_c = pl.reciprocal(jnp.maximum(ctx_len_ref[...], 1.0), approx=True)   # [tb, 1]
        inv_r = pl.reciprocal(jnp.maximum(cand_len_ref[...], 1.0), approx=True)  # [tb, 1]
        pooled = jnp.concatenate(
            [ctx_acc[...] * inv_c, cand_acc[...] * inv_r], axis=0
        ).astype(jnp.bfloat16)                                                   # [2*tb, H]
        # One MXU matmul for both streams; W/b are VMEM-resident (constant index_map).
        h = jnp.tanh(jnp.dot(pooled, w_ref[...],
                             preferred_element_type=jnp.float32) + b_ref[...])   # [2*tb, H] f32
        ctx_cls = h[:tb]
        cand_cls = h[tb:]
        # Single-key poly-code attention collapses exactly to sum_h(ctx * cand)
        # (verified against the full math in __main__).  Output [tb, 1] is a
        # narrow store, but it happens once per batch tile so it is negligible.
        score_ref[...] = jnp.sum(ctx_cls * cand_cls, axis=-1, keepdims=True)


def poly_encoder_scores(ctx_emb, cand_emb, ctx_len, cand_len, w, b,
                        *, tb=8, ts=128, vmem_limit_bytes=32 * 1024 * 1024):
    """ctx_emb/cand_emb: [B, S, H] bf16 (pre-masked), *_len: [B, 1] f32,
    w: [H, H] bf16, b: [1, H] f32  ->  scores [B, 1] f32."""
    B, S, H = ctx_emb.shape
    tb = min(tb, B)
    ts = min(ts, S)
    assert B % tb == 0, f"batch {B} must divide by batch tile {tb}"
    assert S % ts == 0, f"seq length {S} must divide by seq tile {ts}"

    grid = (B // tb, S // ts)
    return pl.pallas_call(
        poly_encoder_kernel,
        out_shape=jax.ShapeDtypeStruct((B, 1), jnp.float32),
        grid=grid,
        in_specs=[
            pl.BlockSpec((tb, ts, H), lambda i, j: (i, j, 0)),   # context embeddings
            pl.BlockSpec((tb, ts, H), lambda i, j: (i, j, 0)),   # candidate embeddings
            pl.BlockSpec((tb, 1), lambda i, j: (i, 0)),          # context token counts
            pl.BlockSpec((tb, 1), lambda i, j: (i, 0)),          # candidate token counts
            pl.BlockSpec((H, H), lambda i, j: (0, 0)),           # W: resident in VMEM
            pl.BlockSpec((1, H), lambda i, j: (0, 0)),           # bias: resident in VMEM
        ],
        out_specs=pl.BlockSpec((tb, 1), lambda i, j: (i, 0)),    # written at last j only
        scratch_shapes=[
            pltpu.VMEM((tb, H), jnp.float32),                    # context accumulator
            pltpu.VMEM((tb, H), jnp.float32),                    # candidate accumulator
        ],
        compiler_params=pltpu.CompilerParams(
            dimension_semantics=("parallel", "arbitrary"),
            vmem_limit_bytes=vmem_limit_bytes,
        ),
    )(ctx_emb, cand_emb, ctx_len, cand_len, w, b)


# ----------------------------------------------------------------------------
# Full forward (labels=None branch of PolyEncoder.forward)
# ----------------------------------------------------------------------------
def poly_encoder_forward(params, context_input_ids, context_input_masks,
                         response_input_ids, response_input_masks):
    # labels is None -> keep only the first candidate.
    resp_ids = response_input_ids[:, 0, :]                 # [B, S]
    resp_masks = response_input_masks[:, 0, :]             # [B, S]

    # Token-embedding gather in bf16; the 0/1 mask multiply fuses into the
    # gather's consumer, so no extra HBM traffic and the lane-padded [B, S, 1]
    # mask tensor never enters the kernel.
    # TODO(synk): fuse the gather itself into the kernel via a manual
    # make_async_copy row-gather (ids via scalar prefetch) to drop the
    # [B, S, H] HBM round-trip entirely.
    ctx_emb = (jnp.take(params['token_emb'], context_input_ids, axis=0)
               * context_input_masks.astype(jnp.bfloat16)[..., None])          # [B,S,H] bf16
    cand_emb = (jnp.take(params['token_emb'], resp_ids, axis=0)
                * resp_masks.astype(jnp.bfloat16)[..., None])                  # [B,S,H] bf16
    ctx_len = jnp.sum(context_input_masks, axis=1, keepdims=True).astype(jnp.float32)
    cand_len = jnp.sum(resp_masks, axis=1, keepdims=True).astype(jnp.float32)

    # Poly-code attention cancels analytically on this path (see kernel comment).
    return poly_encoder_scores(ctx_emb, cand_emb, ctx_len, cand_len,
                               params['lm_w'], params['lm_b'])                 # [B, 1]


# ----------------------------------------------------------------------------
# Pure-JAX reference: the *full* original math (including the degenerate
# poly-code attention), used to verify the simplified kernel.
# ----------------------------------------------------------------------------
def reference_forward(params, context_input_ids, context_input_masks,
                      response_input_ids, response_input_masks):
    resp_ids = response_input_ids[:, 0, :]
    resp_masks = response_input_masks[:, 0, :]

    def encode(ids, masks):
        emb = jnp.take(params['token_emb'], ids, axis=0).astype(jnp.float32)
        m = masks.astype(jnp.float32)
        pooled = jnp.sum(emb * m[..., None], axis=1)
        pooled = pooled / jnp.maximum(jnp.sum(m, axis=1, keepdims=True), 1.0)
        h = jnp.dot(pooled.astype(jnp.bfloat16), params['lm_w'],
                    preferred_element_type=jnp.float32) + params['lm_b']
        return jnp.tanh(h)

    ctx = encode(context_input_ids, context_input_masks)               # [B, H]
    cand = encode(resp_ids, resp_masks)                                # [B, H]

    poly = params['poly_codes'].astype(jnp.float32)                    # [M, H]
    ctx3 = ctx[:, None, :]                                             # [B, 1, H] k=v
    aw1 = jax.nn.softmax(jnp.einsum('mh,bkh->bmk', poly, ctx3), axis=-1)      # [B,M,1]
    context_embs = jnp.einsum('bmk,bkh->bmh', aw1, ctx3)                      # [B,M,H]
    aw2 = jax.nn.softmax(jnp.einsum('bh,bmh->bm', cand, context_embs), axis=-1)
    attn = jnp.einsum('bm,bmh->bh', aw2, context_embs)                        # [B,H]
    return jnp.sum(attn * cand, axis=-1, keepdims=True)                       # [B,1]


def init_params(key, vocab, hidden, poly_m):
    k1, k2, k3, k4 = jax.random.split(key, 4)
    # nn.init.normal_(poly_code_embeddings, hidden_size ** -0.5): second positional
    # arg is the *mean* in torch, std stays 1.0 — reproduced here.
    poly_codes = (hidden ** -0.5) + jax.random.normal(k1, (poly_m, hidden),
                                                      dtype=jnp.float32)
    return {
        'poly_codes': poly_codes,                                              # [M, H] f32
        'token_emb': (0.02 * jax.random.normal(k2, (vocab, hidden),
                                               jnp.float32)).astype(jnp.bfloat16),
        'lm_w': ((hidden ** -0.5) * jax.random.normal(k3, (hidden, hidden),
                                                      jnp.float32)).astype(jnp.bfloat16),
        'lm_b': 0.01 * jax.random.normal(k4, (1, hidden), jnp.float32),
    }


if __name__ == "__main__":
    # Lane-aligned hidden size (128) and a sequence long enough to exercise the
    # tiled S-reduction grid; total activations are only a couple of MB.
    B, R, S, H, M, V = 16, 2, 256, 128, 8, 512

    key = jax.random.PRNGKey(0)
    kp, k1, k2, k3, k4 = jax.random.split(key, 5)
    params = init_params(kp, V, H, M)

    context_input_ids = jax.random.randint(k1, (B, S), 0, V, dtype=jnp.int32)
    response_input_ids = jax.random.randint(k2, (B, R, S), 0, V, dtype=jnp.int32)

    # masks: 1 for the first `len` tokens, 0 afterwards
    ctx_lens = jax.random.randint(k3, (B, 1), S // 2, S + 1)
    context_input_masks = (jnp.arange(S)[None, :] < ctx_lens).astype(jnp.int32)
    resp_lens = jax.random.randint(k4, (B, R, 1), S // 2, S + 1)
    response_input_masks = (jnp.arange(S)[None, None, :] < resp_lens).astype(jnp.int32)

    fwd = jax.jit(functools.partial(poly_encoder_forward, params))
    scores = fwd(context_input_ids, context_input_masks,
                 response_input_ids, response_input_masks)
    jax.block_until_ready(scores)

    assert scores.shape == (B, 1) and scores.dtype == jnp.float32

    # Check against the full (un-simplified) reference math.
    ref = reference_forward(params, context_input_ids, context_input_masks,
                            response_input_ids, response_input_masks)
    max_diff = float(jnp.max(jnp.abs(scores - ref)))
    assert jnp.allclose(scores, ref, rtol=5e-2, atol=2e-4), f"max diff {max_diff}"

    print("KERNEL_OK")
</pallas_src>

<mosaic_0001>
module attributes {stable_mosaic.version = 11 : i64} {
  func.func @poly_encoder_kernel(%arg0: i32, %arg1: i32, %arg2: memref<8x128x128xbf16, #tpu.memory_space<vmem>>, %arg3: memref<8x128x128xbf16, #tpu.memory_space<vmem>>, %arg4: memref<8x1xf32, #tpu.memory_space<vmem>>, %arg5: memref<8x1xf32, #tpu.memory_space<vmem>>, %arg6: memref<128x128xbf16, #tpu.memory_space<vmem>>, %arg7: memref<1x128xf32, #tpu.memory_space<vmem>>, %arg8: memref<8x1xf32, #tpu.memory_space<vmem>>, %arg9: memref<8x128xf32, #tpu.memory_space<vmem>>, %arg10: memref<8x128xf32, #tpu.memory_space<vmem>>) attributes {dimension_semantics = [#tpu.dimension_semantics<parallel>, #tpu.dimension_semantics<arbitrary>], iteration_bounds = array<i64: 2, 2>, scalar_prefetch = 0 : i64, scratch_operands = 2 : i64, tpu.core_type = #tpu.core_type<tc>, window_params = [{transform_indices = @transform_0, window_bounds = array<i64: 8, 128, 128>}, {transform_indices = @transform_1, window_bounds = array<i64: 8, 128, 128>}, {transform_indices = @transform_2, window_bounds = array<i64: 8, 1>}, {transform_indices = @transform_3, window_bounds = array<i64: 8, 1>}, {pipeline_mode = #tpu.pipeline_mode<synchronous>, transform_indices = @transform_4, window_bounds = array<i64: 128, 128>}, {pipeline_mode = #tpu.pipeline_mode<synchronous>, transform_indices = @transform_5, window_bounds = array<i64: 1, 128>}, {transform_indices = @transform_6, window_bounds = array<i64: 8, 1>}]} {
    %c0_i32 = arith.constant 0 : i32
    %0 = arith.cmpi eq, %arg1, %c0_i32 : i32
    %1 = arith.extui %0 : i1 to i32
    %c0_i32_0 = arith.constant 0 : i32
    %2 = arith.cmpi ne, %1, %c0_i32_0 : i32
    scf.if %2 {
      %cst_16 = arith.constant 0.000000e+00 : f32
      %18 = vector.broadcast %cst_16 : f32 to vector<8x128xf32>
      %c0_17 = arith.constant 0 : index
      %c0_18 = arith.constant 0 : index
      %19 = vector.load %arg9[%c0_17, %c0_18] : memref<8x128xf32, #tpu.memory_space<vmem>>, vector<8x128xf32>
      tpu.vector_store %arg9[%c0_17, %c0_18], %18 {strides = array<i32>} : memref<8x128xf32, #tpu.memory_space<vmem>>, vector<8x128xf32>,
      %cst_19 = arith.constant 0.000000e+00 : f32
      %20 = vector.broadcast %cst_19 : f32 to vector<8x128xf32>
      %c0_20 = arith.constant 0 : index
      %c0_21 = arith.constant 0 : index
      %21 = vector.load %arg10[%c0_20, %c0_21] : memref<8x128xf32, #tpu.memory_space<vmem>>, vector<8x128xf32>
      tpu.vector_store %arg10[%c0_20, %c0_21], %20 {strides = array<i32>} : memref<8x128xf32, #tpu.memory_space<vmem>>, vector<8x128xf32>,
    } else {
    }
    %c0 = arith.constant 0 : index
    %c0_1 = arith.constant 0 : index
    %3 = vector.load %arg9[%c0, %c0_1] : memref<8x128xf32, #tpu.memory_space<vmem>>, vector<8x128xf32>
    %c0_2 = arith.constant 0 : index
    %c0_3 = arith.constant 0 : index
    %c0_4 = arith.constant 0 : index
    %4 = vector.load %arg2[%c0_2, %c0_3, %c0_4] : memref<8x128x128xbf16, #tpu.memory_space<vmem>>, vector<8x128x128xbf16>
    %5 = arith.extf %4 : vector<8x128x128xbf16> to vector<8x128x128xf32>
    %cst = arith.constant dense<0.000000e+00> : vector<8x128xf32>
    %6 = vector.multi_reduction <add>, %5, %cst [1] : vector<8x128x128xf32> to vector<8x128xf32>
    %7 = arith.addf %3, %6 : vector<8x128xf32>
    %c0_5 = arith.constant 0 : index
    %c0_6 = arith.constant 0 : index
    %8 = vector.load %arg9[%c0_5, %c0_6] : memref<8x128xf32, #tpu.memory_space<vmem>>, vector<8x128xf32>
    tpu.vector_store %arg9[%c0_5, %c0_6], %7 {strides = array<i32>} : memref<8x128xf32, #tpu.memory_space<vmem>>, vector<8x128xf32>,
    %c0_7 = arith.constant 0 : index
    %c0_8 = arith.constant 0 : index
    %9 = vector.load %arg10[%c0_7, %c0_8] : memref<8x128xf32, #tpu.memory_space<vmem>>, vector<8x128xf32>
    %c0_9 = arith.constant 0 : index
    %c0_10 = arith.constant 0 : index
    %c0_11 = arith.constant 0 : index
    %10 = vector.load %arg3[%c0_9, %c0_10, %c0_11] : memref<8x128x128xbf16, #tpu.memory_space<vmem>>, vector<8x128x128xbf16>
    %11 = arith.extf %10 : vector<8x128x128xbf16> to vector<8x128x128xf32>
    %cst_12 = arith.constant dense<0.000000e+00> : vector<8x128xf32>
    %12 = vector.multi_reduction <add>, %11, %cst_12 [1] : vector<8x128x128xf32> to vector<8x128xf32>
    %13 = arith.addf %9, %12 : vector<8x128xf32>
    %c0_13 = arith.constant 0 : index
    %c0_14 = arith.constant 0 : index
    %14 = vector.load %arg10[%c0_13, %c0_14] : memref<8x128xf32, #tpu.memory_space<vmem>>, vector<8x128xf32>
    tpu.vector_store %arg10[%c0_13, %c0_14], %13 {strides = array<i32>} : memref<8x128xf32, #tpu.memory_space<vmem>>, vector<8x128xf32>,
    %c1_i32 = arith.constant 1 : i32
    %15 = arith.cmpi eq, %arg1, %c1_i32 : i32
    %16 = arith.extui %15 : i1 to i32
    %c0_i32_15 = arith.constant 0 : i32
    %17 = arith.cmpi ne, %16, %c0_i32_15 : i32
    scf.if %17 {
      %c0_16 = arith.constant 0 : index
      %c0_17 = arith.constant 0 : index
      %18 = vector.load %arg4[%c0_16, %c0_17] : memref<8x1xf32, #tpu.memory_space<vmem>>, vector<8x1xf32>
      %cst_18 = arith.constant 1.000000e+00 : f32
      %19 = vector.broadcast %cst_18 : f32 to vector<8x1xf32>
      %20 = arith.maximumf %18, %19 : vector<8x1xf32>
      %21 = tpu.reciprocal %20 {approx = true} : vector<8x1xf32> -> vector<8x1xf32>
      %c0_19 = arith.constant 0 : index
      %c0_20 = arith.constant 0 : index
      %22 = vector.load %arg5[%c0_19, %c0_20] : memref<8x1xf32, #tpu.memory_space<vmem>>, vector<8x1xf32>
      %cst_21 = arith.constant 1.000000e+00 : f32
      %23 = vector.broadcast %cst_21 : f32 to vector<8x1xf32>
      %24 = arith.maximumf %22, %23 : vector<8x1xf32>
      %25 = tpu.reciprocal %24 {approx = true} : vector<8x1xf32> -> vector<8x1xf32>
      %c0_22 = arith.constant 0 : index
      %c0_23 = arith.constant 0 : index
      %26 = vector.load %arg9[%c0_22, %c0_23] : memref<8x128xf32, #tpu.memory_space<vmem>>, vector<8x128xf32>
      %27 = vector.broadcast %21 : vector<8x1xf32> to vector<8x128xf32>
      %28 = arith.mulf %26, %27 : vector<8x128xf32>
      %c0_24 = arith.constant 0 : index
      %c0_25 = arith.constant 0 : index
      %29 = vector.load %arg10[%c0_24, %c0_25] : memref<8x128xf32, #tpu.memory_space<vmem>>, vector<8x128xf32>
      %30 = vector.broadcast %25 : vector<8x1xf32> to vector<8x128xf32>
      %31 = arith.mulf %29, %30 : vector<8x128xf32>
      %32 = tpu.concatenate %28, %31 in 0 : vector<8x128xf32>, vector<8x128xf32> -> vector<16x128xf32>
      %33 = arith.truncf %32 : vector<16x128xf32> to vector<16x128xbf16>
      %c0_26 = arith.constant 0 : index
      %c0_27 = arith.constant 0 : index
      %34 = vector.load %arg6[%c0_26, %c0_27] : memref<128x128xbf16, #tpu.memory_space<vmem>>, vector<128x128xbf16>
      %cst_28 = arith.constant dense<0.000000e+00> : vector<16x128xf32>
      %35 = tpu.matmul %33, %34, %cst_28 {dimension_numbers = #tpu.dot_dimension_numbers<[1], [0], [0], [1], [0, 0, 1, 1], [], []>} : vector<16x128xbf16>, vector<128x128xbf16>, vector<16x128xf32> -> vector<16x128xf32>
      %c0_29 = arith.constant 0 : index
      %c0_30 = arith.constant 0 : index
      %36 = vector.load %arg7[%c0_29, %c0_30] : memref<1x128xf32, #tpu.memory_space<vmem>>, vector<1x128xf32>
      %37 = vector.broadcast %36 : vector<1x128xf32> to vector<16x128xf32>
      %38 = arith.addf %35, %37 : vector<16x128xf32>
      %39 = math.tanh %38 : vector<16x128xf32>
      %40 = vector.extract_strided_slice %39 {offsets = [0, 0], sizes = [8, 128], strides = [1, 1]} : vector<16x128xf32> to vector<8x128xf32>
      %41 = vector.extract_strided_slice %39 {offsets = [8, 0], sizes = [8, 128], strides = [1, 1]} : vector<16x128xf32> to vector<8x128xf32>
      %42 = arith.mulf %40, %41 : vector<8x128xf32>
      %cst_31 = arith.constant dense<0.000000e+00> : vector<8xf32>
      %43 = vector.multi_reduction <add>, %42, %cst_31 [1] : vector<8x128xf32> to vector<8xf32>
      %44 = vector.shape_cast %43 : vector<8xf32> to vector<8x1xf32>
      %c0_32 = arith.constant 0 : index
      %c0_33 = arith.constant 0 : index
      %45 = vector.load %arg8[%c0_32, %c0_33] : memref<8x1xf32, #tpu.memory_space<vmem>>, vector<8x1xf32>
      tpu.vector_store %arg8[%c0_32, %c0_33], %44 {strides = array<i32>} : memref<8x1xf32, #tpu.memory_space<vmem>>, vector<8x1xf32>,
    } else {
    }
    return
  }
  func.func @transform_0(%arg0: i32, %arg1: i32) -> (i32, i32, i32) {
    %c0_i32 = arith.constant 0 : i32
    %c0_i32_0 = arith.constant 0 : i32
    return %arg0, %arg1, %c0_i32 : i32, i32, i32
  }
  func.func @transform_1(%arg0: i32, %arg1: i32) -> (i32, i32, i32) {
    %c0_i32 = arith.constant 0 : i32
    %c0_i32_0 = arith.constant 0 : i32
    return %arg0, %arg1, %c0_i32 : i32, i32, i32
  }
  func.func @transform_2(%arg0: i32, %arg1: i32) -> (i32, i32) {
    %c0_i32 = arith.constant 0 : i32
    %c0_i32_0 = arith.constant 0 : i32
    return %arg0, %c0_i32 : i32, i32
  }
  func.func @transform_3(%arg0: i32, %arg1: i32) -> (i32, i32) {
    %c0_i32 = arith.constant 0 : i32
    %c0_i32_0 = arith.constant 0 : i32
    return %arg0, %c0_i32 : i32, i32
  }
  func.func @transform_4(%arg0: i32, %arg1: i32) -> (i32, i32) {
    %c0_i32 = arith.constant 0 : i32
    %c0_i32_0 = arith.constant 0 : i32
    %c0_i32_1 = arith.constant 0 : i32
    return %c0_i32, %c0_i32_0 : i32, i32
  }
  func.func @transform_5(%arg0: i32, %arg1: i32) -> (i32, i32) {
    %c0_i32 = arith.constant 0 : i32
    %c0_i32_0 = arith.constant 0 : i32
    %c0_i32_1 = arith.constant 0 : i32
    return %c0_i32, %c0_i32_0 : i32, i32
  }
  func.func @transform_6(%arg0: i32, %arg1: i32) -> (i32, i32) {
    %c0_i32 = arith.constant 0 : i32
    %c0_i32_0 = arith.constant 0 : i32
    return %arg0, %c0_i32 : i32, i32
  }
}

</mosaic_0001>

<bundles_post_ra>
// kernel: poly_encoder_forward.1
= control target key start
LH: loop header
LB: loop body
LE: loop exit
PB: predicated region body
PF: predicated region fallthrough
CT: control target
= control target key end

     0   :  { %s3466_s21 = smov 0   ;;  %s3468_s22 = smov 0   ;;  %s4998_s0 = inlined_call_operand.vmem [shape: bf16[16,256,128], index: 0, kind: input, shape index: {}]   ;;  %s4999_s1 = inlined_call_operand.vmem [shape: bf16[16,256,128], index: 1, kind: input, shape index: {}]   ;;  %s5000_s2 = inlined_call_operand.vmem [shape: f32[16,1], index: 2, kind: input, shape index: {}]   ;;  %s5001_s3 = inlined_call_operand.vmem [shape: f32[16,1], index: 3, kind: input, shape index: {}]   ;;  %s5002_s4 = inlined_call_operand.vmem [shape: bf16[128,128], index: 4, kind: input, shape index: {}]   ;;  %s5003_s5 = inlined_call_operand.vmem [shape: f32[1,128], index: 5, kind: input, shape index: {}]   ;;  %s5004_s6 = inlined_call_operand.vmem [shape: f32[16,1], index: 6, kind: output, shape index: {}]  }
   0x1   :  { %s3470_s23 = smov 0   ;;  %s3472_s24 = smov 0  }
   0x2   :  { %s3474_s25 = smov 0   ;;  %s3476_s26 = smov 0  }
   0x3   :  { %s3478_s27 = smov 0  }
   0x4 LB: > { %s25_s28 = sadd.s32 1, %s3417_s25  ;;  %s28_s29 = sadd.s32 1, %s3421_s26  ;;  %s3425_s27 = sphi %s3478_s27, %s16_s27   ;;  %s3421_s26 = sphi %s3476_s26, %s5413_s26   ;;  %s3417_s25 = sphi %s3474_s25, %s5412_s25   ;;  %s3413_s24 = sphi %s3472_s24, %s5411_s24   ;;  %s3409_s23 = sphi %s3470_s23, %s5410_s23   ;;  %s3405_s22 = sphi %s3468_s22, %s5409_s22   ;;  %s3401_s21 = sphi %s3466_s21, %s5408_s21  }
   0x5   : > { %p26_p0 = scmp.ge.s32.totalorder %s25_s28, 2  ;;  %p44_p1 = scmp.ne.s32.totalorder %s3405_s22, %s3401_s21 }
   0x6   : > { %p45_p2 = scmp.eq.s32.totalorder %s3425_s27, 0  ;;  %s37_s10 = sadd.s32 1, %s3405_s22 }
   0x7   : > { %s5415_s28 = smov (%p26_p0, %s25_s28), 0  ;;  %s5417_s29 = smov (!%p26_p0, %s28_s29), %s3421_s26 }
   0x8   : > { %p3509_p3 = por %p45_p2, %p44_p1  ;;  %p30_p4 = scmp.ge.s32.totalorder %s5417_s29, 2 }
   0x9   : > { %s33_s7 = ssub.s32 %s3417_s25, %s5415_s28  ;;  %p2595_p6 = scmp.ge.s32.totalorder %s3425_s27, 4 }
   0xa   : > { %s5419_s29 = smov (%p30_p4, %s5417_s29), 0 }
   0xb   : > { %s32_s8 = ssub.s32 %s3421_s26, %s5419_s29  ;;  %224 = sbr.rel (%p2595_p6) target bundleno = 96 (0x60), region = 24 }
   0xc   : > { %s34_s9 = sor.u32 %s33_s7, %s32_s8 }
   0xd   : > { %p35_p5 = scmp.eq.s32.totalorder %s34_s9, 0 }
   0xf   : > { %s3521_s11 = scalar_select %p35_p5, %s3405_s22, %s37_s10  }
  0x12   : > { %227 = sbr.rel (!%p3509_p3) target bundleno = 57 (0x39), region = 28  ;;  %s229_s12 = sand.u32 (%p3509_p3), 1, %s3405_s22  }
  0x13   : > { %s2598_s13 = sshll.u32 (%p3509_p3), %s3417_s25, 4  ;;  %s2596_s14 = sshll.u32 (%p3509_p3), %s229_s12, 9 }
  0x14   : > { %s2625_s15 = sshll.u32 (%p3509_p3), %s3421_s26, 8  ;;  %s3537_s7 = scalar_lea.vmem (%p3509_p3), [#allocation4], %s2596_s14 }
  0x15   : > { %s235_s16 = sadd.s32 (%p3509_p3), %s2625_s15, %s2598_s13 }
  0x16   : > { %s2600_s17 = sshll.u32 (%p3509_p3), %s235_s16, 2 }
  0x17   : > { %s3532_s20 = scalar_lea.vmem (%p3509_p3), %s4998_s0, %s2600_s17 }
  0x18   : > { %v253_v0 = vld [vmem:[%s3532_s20] sm:$0xff] (%p3509_p3)   ;;  %v257_v1 = vld [vmem:[%s3532_s20 + $0x8] sm:$0xff] (%p3509_p3)   ;;  %v261_v2 = vld [vmem:[%s3532_s20 + $0x10] sm:$0xff] (%p3509_p3)  }
  0x19   : > { %254 = vst [vmem:[%s3537_s7] sm:$0xff] %v253_v0   ;;  %258 = vst [vmem:[%s3537_s7 + $0x8] sm:$0xff] %v257_v1   ;;  %v265_v3 = vld [vmem:[%s3532_s20 + $0x18] sm:$0xff]   ;;  %v269_v4 = vld [vmem:[%s3532_s20 + $0x20] sm:$0xff]  }
  0x1a   : > { %262 = vst [vmem:[%s3537_s7 + $0x10] sm:$0xff] %v261_v2   ;;  %v273_v5 = vld [vmem:[%s3532_s20 + $0x28] sm:$0xff]   ;;  %266 = vst [vmem:[%s3537_s7 + $0x18] sm:$0xff] %v265_v3   ;;  %v277_v6 = vld [vmem:[%s3532_s20 + $0x30] sm:$0xff]  }
  0x1b   : > { %270 = vst [vmem:[%s3537_s7 + $0x20] sm:$0xff] %v269_v4   ;;  %274 = vst [vmem:[%s3537_s7 + $0x28] sm:$0xff] %v273_v5   ;;  %v281_v7 = vld [vmem:[%s3532_s20 + $0x38] sm:$0xff]   ;;  %v285_v8 = vld [vmem:[%s3532_s20 + $0x80] sm:$0xff]  }
  0x1c   : > { %278 = vst [vmem:[%s3537_s7 + $0x30] sm:$0xff] %v277_v6   ;;  %282 = vst [vmem:[%s3537_s7 + $0x38] sm:$0xff] %v281_v7   ;;  %v289_v9 = vld [vmem:[%s3532_s20 + $0x88] sm:$0xff]   ;;  %v293_v10 = vld [vmem:[%s3532_s20 + $0x90] sm:$0xff]  }
  0x1d   : > { %286 = vst [vmem:[%s3537_s7 + $0x40] sm:$0xff] %v285_v8   ;;  %v297_v11 = vld [vmem:[%s3532_s20 + $0x98] sm:$0xff]   ;;  %290 = vst [vmem:[%s3537_s7 + $0x48] sm:$0xff] %v289_v9   ;;  %v301_v12 = vld [vmem:[%s3532_s20 + $0xa0] sm:$0xff]  }
  0x1e   : > { %294 = vst [vmem:[%s3537_s7 + $0x50] sm:$0xff] %v293_v10   ;;  %298 = vst [vmem:[%s3537_s7 + $0x58] sm:$0xff] %v297_v11   ;;  %v305_v13 = vld [vmem:[%s3532_s20 + $0xa8] sm:$0xff]   ;;  %v309_v14 = vld [vmem:[%s3532_s20 + $0xb0] sm:$0xff]  }
  0x1f   : > { %302 = vst [vmem:[%s3537_s7 + $0x60] sm:$0xff] %v301_v12   ;;  %306 = vst [vmem:[%s3537_s7 + $0x68] sm:$0xff] %v305_v13   ;;  %v313_v15 = vld [vmem:[%s3532_s20 + $0xb8] sm:$0xff]   ;;  %v317_v16 = vld [vmem:[%s3532_s20 + $0x100] sm:$0xff]  }
  0x20   : > { %310 = vst [vmem:[%s3537_s7 + $0x70] sm:$0xff] %v309_v14   ;;  %v321_v17 = vld [vmem:[%s3532_s20 + $0x108] sm:$0xff]   ;;  %314 = vst [vmem:[%s3537_s7 + $0x78] sm:$0xff] %v313_v15   ;;  %v325_v18 = vld [vmem:[%s3532_s20 + $0x110] sm:$0xff]  }
  0x21   : > { %318 = vst [vmem:[%s3537_s7 + $0x80] sm:$0xff] %v317_v16   ;;  %322 = vst [vmem:[%s3537_s7 + $0x88] sm:$0xff] %v321_v17   ;;  %v329_v19 = vld [vmem:[%s3532_s20 + $0x118] sm:$0xff]   ;;  %v333_v20 = vld [vmem:[%s3532_s20 + $0x120] sm:$0xff]  }
  0x22   : > { %326 = vst [vmem:[%s3537_s7 + $0x90] sm:$0xff] %v325_v18   ;;  %330 = vst [vmem:[%s3537_s7 + $0x98] sm:$0xff] %v329_v19   ;;  %v337_v21 = vld [vmem:[%s3532_s20 + $0x128] sm:$0xff]   ;;  %v341_v22 = vld [vmem:[%s3532_s20 + $0x130] sm:$0xff]  }
  0x23   : > { %334 = vst [vmem:[%s3537_s7 + $0xa0] sm:$0xff] %v333_v20   ;;  %v345_v23 = vld [vmem:[%s3532_s20 + $0x138] sm:$0xff]   ;;  %338 = vst [vmem:[%s3537_s7 + $0xa8] sm:$0xff] %v337_v21   ;;  %v349_v24 = vld [vmem:[%s3532_s20 + $0x180] sm:$0xff]  }
  0x24   : > { %342 = vst [vmem:[%s3537_s7 + $0xb0] sm:$0xff] %v341_v22   ;;  %346 = vst [vmem:[%s3537_s7 + $0xb8] sm:$0xff] %v345_v23   ;;  %v353_v25 = vld [vmem:[%s3532_s20 + $0x188] sm:$0xff]   ;;  %v357_v26 = vld [vmem:[%s3532_s20 + $0x190] sm:$0xff]  }
  0x25   : > { %350 = vst [vmem:[%s3537_s7 + $0xc0] sm:$0xff] %v349_v24   ;;  %354 = vst [vmem:[%s3537_s7 + $0xc8] sm:$0xff] %v353_v25   ;;  %v361_v27 = vld [vmem:[%s3532_s20 + $0x198] sm:$0xff]   ;;  %v365_v28 = vld [vmem:[%s3532_s20 + $0x1a0] sm:$0xff]  }
  0x26   : > { %358 = vst [vmem:[%s3537_s7 + $0xd0] sm:$0xff] %v357_v26   ;;  %v369_v29 = vld [vmem:[%s3532_s20 + $0x1a8] sm:$0xff]   ;;  %362 = vst [vmem:[%s3537_s7 + $0xd8] sm:$0xff] %v361_v27   ;;  %v373_v30 = vld [vmem:[%s3532_s20 + $0x1b0] sm:$0xff]  }
  0x27   : > { %366 = vst [vmem:[%s3537_s7 + $0xe0] sm:$0xff] %v365_v28   ;;  %370 = vst [vmem:[%s3537_s7 + $0xe8] sm:$0xff] %v369_v29   ;;  %v377_v31 = vld [vmem:[%s3532_s20 + $0x1b8] sm:$0xff]   ;;  %v381_v32 = vld [vmem:[%s3532_s20 + $0x200] sm:$0xff]  }
  0x28   : > { %374 = vst [vmem:[%s3537_s7 + $0xf0] sm:$0xff] %v373_v30   ;;  %378 = vst [vmem:[%s3537_s7 + $0xf8] sm:$0xff] %v377_v31   ;;  %v385_v33 = vld [vmem:[%s3532_s20 + $0x208] sm:$0xff]   ;;  %v389_v34 = vld [vmem:[%s3532_s20 + $0x210] sm:$0xff]  }
  0x29   : > { %382 = vst [vmem:[%s3537_s7 + $0x100] sm:$0xff] %v381_v32   ;;  %v393_v35 = vld [vmem:[%s3532_s20 + $0x218] sm:$0xff]   ;;  %386 = vst [vmem:[%s3537_s7 + $0x108] sm:$0xff] %v385_v33   ;;  %v397_v36 = vld [vmem:[%s3532_s20 + $0x220] sm:$0xff]  }
  0x2a   : > { %390 = vst [vmem:[%s3537_s7 + $0x110] sm:$0xff] %v389_v34   ;;  %394 = vst [vmem:[%s3537_s7 + $0x118] sm:$0xff] %v393_v35   ;;  %v401_v37 = vld [vmem:[%s3532_s20 + $0x228] sm:$0xff]   ;;  %v405_v38 = vld [vmem:[%s3532_s20 + $0x230] sm:$0xff]  }
  0x2b   : > { %398 = vst [vmem:[%s3537_s7 + $0x120] sm:$0xff] %v397_v36   ;;  %402 = vst [vmem:[%s3537_s7 + $0x128] sm:$0xff] %v401_v37   ;;  %v409_v39 = vld [vmem:[%s3532_s20 + $0x238] sm:$0xff]   ;;  %v413_v40 = vld [vmem:[%s3532_s20 + $0x280] sm:$0xff]  }
  0x2c   : > { %406 = vst [vmem:[%s3537_s7 + $0x130] sm:$0xff] %v405_v38   ;;  %v417_v41 = vld [vmem:[%s3532_s20 + $0x288] sm:$0xff]   ;;  %410 = vst [vmem:[%s3537_s7 + $0x138] sm:$0xff] %v409_v39   ;;  %v421_v42 = vld [vmem:[%s3532_s20 + $0x290] sm:$0xff]  }
  0x2d   : > { %414 = vst [vmem:[%s3537_s7 + $0x140] sm:$0xff] %v413_v40   ;;  %418 = vst [vmem:[%s3537_s7 + $0x148] sm:$0xff] %v417_v41   ;;  %v425_v43 = vld [vmem:[%s3532_s20 + $0x298] sm:$0xff]   ;;  %v429_v44 = vld [vmem:[%s3532_s20 + $0x2a0] sm:$0xff]  }
  0x2e   : > { %422 = vst [vmem:[%s3537_s7 + $0x150] sm:$0xff] %v421_v42   ;;  %426 = vst [vmem:[%s3537_s7 + $0x158] sm:$0xff] %v425_v43   ;;  %v433_v45 = vld [vmem:[%s3532_s20 + $0x2a8] sm:$0xff]   ;;  %v437_v46 = vld [vmem:[%s3532_s20 + $0x2b0] sm:$0xff]  }
  0x2f   : > { %430 = vst [vmem:[%s3537_s7 + $0x160] sm:$0xff] %v429_v44   ;;  %v441_v47 = vld [vmem:[%s3532_s20 + $0x2b8] sm:$0xff]   ;;  %434 = vst [vmem:[%s3537_s7 + $0x168] sm:$0xff] %v433_v45   ;;  %v445_v48 = vld [vmem:[%s3532_s20 + $0x300] sm:$0xff]  }
  0x30   : > { %438 = vst [vmem:[%s3537_s7 + $0x170] sm:$0xff] %v437_v46   ;;  %442 = vst [vmem:[%s3537_s7 + $0x178] sm:$0xff] %v441_v47   ;;  %v449_v49 = vld [vmem:[%s3532_s20 + $0x308] sm:$0xff]   ;;  %v453_v50 = vld [vmem:[%s3532_s20 + $0x310] sm:$0xff]  }
  0x31   : > { %446 = vst [vmem:[%s3537_s7 + $0x180] sm:$0xff] %v445_v48   ;;  %450 = vst [vmem:[%s3537_s7 + $0x188] sm:$0xff] %v449_v49   ;;  %v457_v51 = vld [vmem:[%s3532_s20 + $0x318] sm:$0xff]   ;;  %v461_v52 = vld [vmem:[%s3532_s20 + $0x320] sm:$0xff]  }
  0x32   : > { %454 = vst [vmem:[%s3537_s7 + $0x190] sm:$0xff] %v453_v50   ;;  %v465_v53 = vld [vmem:[%s3532_s20 + $0x328] sm:$0xff]   ;;  %458 = vst [vmem:[%s3537_s7 + $0x198] sm:$0xff] %v457_v51   ;;  %v469_v54 = vld [vmem:[%s3532_s20 + $0x330] sm:$0xff]  }
  0x33   : > { %462 = vst [vmem:[%s3537_s7 + $0x1a0] sm:$0xff] %v461_v52   ;;  %466 = vst [vmem:[%s3537_s7 + $0x1a8] sm:$0xff] %v465_v53   ;;  %v473_v55 = vld [vmem:[%s3532_s20 + $0x338] sm:$0xff]   ;;  %v477_v56 = vld [vmem:[%s3532_s20 + $0x380] sm:$0xff]  }
  0x34   : > { %470 = vst [vmem:[%s3537_s7 + $0x1b0] sm:$0xff] %v469_v54   ;;  %474 = vst [vmem:[%s3537_s7 + $0x1b8] sm:$0xff] %v473_v55   ;;  %v481_v57 = vld [vmem:[%s3532_s20 + $0x388] sm:$0xff]   ;;  %v485_v58 = vld [vmem:[%s3532_s20 + $0x390] sm:$0xff]  }
  0x35   : > { %478 = vst [vmem:[%s3537_s7 + $0x1c0] sm:$0xff] %v477_v56   ;;  %v489_v59 = vld [vmem:[%s3532_s20 + $0x398] sm:$0xff]   ;;  %482 = vst [vmem:[%s3537_s7 + $0x1c8] sm:$0xff] %v481_v57   ;;  %v493_v60 = vld [vmem:[%s3532_s20 + $0x3a0] sm:$0xff]  }
  0x36   : > { %486 = vst [vmem:[%s3537_s7 + $0x1d0] sm:$0xff] %v485_v58   ;;  %490 = vst [vmem:[%s3537_s7 + $0x1d8] sm:$0xff] %v489_v59   ;;  %v497_v61 = vld [vmem:[%s3532_s20 + $0x3a8] sm:$0xff]   ;;  %v501_v62 = vld [vmem:[%s3532_s20 + $0x3b0] sm:$0xff]  }
  0x37   : > { %494 = vst [vmem:[%s3537_s7 + $0x1e0] sm:$0xff] %v493_v60   ;;  %498 = vst [vmem:[%s3537_s7 + $0x1e8] sm:$0xff] %v497_v61   ;;  %v505_v63 = vld [vmem:[%s3532_s20 + $0x3b8] sm:$0xff]  }
  0x38   : > { %502 = vst [vmem:[%s3537_s7 + $0x1f0] sm:$0xff] %v501_v62   ;;  %506 = vst [vmem:[%s3537_s7 + $0x1f8] sm:$0xff] %v505_v63  }
  0x39 PF: > { %787 = sbr.rel (!%p3509_p3) target bundleno = 96 (0x60), region = 69  ;;  %s789_s8 = sand.u32 (%p3509_p3), 1, %s3405_s22  }
  0x3a   : > { %s2603_s9 = sshll.u32 (%p3509_p3), %s3417_s25, 4  ;;  %s2601_s10 = sshll.u32 (%p3509_p3), %s789_s8, 9 }
  0x3b   : > { %s2626_s12 = sshll.u32 (%p3509_p3), %s3421_s26, 8  ;;  %s3677_s30 = scalar_lea.vmem (%p3509_p3), [#allocation5], %s2601_s10 }
  0x3c   : > { %s795_s13 = sadd.s32 (%p3509_p3), %s2626_s12, %s2603_s9 }
  0x3d   : > { %s2605_s14 = sshll.u32 (%p3509_p3), %s795_s13, 2 }
  0x3e   : > { %s3672_s17 = scalar_lea.vmem (%p3509_p3), %s4999_s1, %s2605_s14 }
  0x3f   : > { %v813_v0 = vld [vmem:[%s3672_s17] sm:$0xff] (%p3509_p3)   ;;  %v817_v1 = vld [vmem:[%s3672_s17 + $0x8] sm:$0xff] (%p3509_p3)   ;;  %v821_v2 = vld [vmem:[%s3672_s17 + $0x10] sm:$0xff] (%p3509_p3)  }
  0x40   : > { %814 = vst [vmem:[%s3677_s30] sm:$0xff] %v813_v0   ;;  %818 = vst [vmem:[%s3677_s30 + $0x8] sm:$0xff] %v817_v1   ;;  %v825_v3 = vld [vmem:[%s3672_s17 + $0x18] sm:$0xff]   ;;  %v829_v4 = vld [vmem:[%s3672_s17 + $0x20] sm:$0xff]  }
  0x41   : > { %822 = vst [vmem:[%s3677_s30 + $0x10] sm:$0xff] %v821_v2   ;;  %v833_v5 = vld [vmem:[%s3672_s17 + $0x28] sm:$0xff]   ;;  %826 = vst [vmem:[%s3677_s30 + $0x18] sm:$0xff] %v825_v3   ;;  %v837_v6 = vld [vmem:[%s3672_s17 + $0x30] sm:$0xff]  }
  0x42   : > { %830 = vst [vmem:[%s3677_s30 + $0x20] sm:$0xff] %v829_v4   ;;  %834 = vst [vmem:[%s3677_s30 + $0x28] sm:$0xff] %v833_v5   ;;  %v841_v7 = vld [vmem:[%s3672_s17 + $0x38] sm:$0xff]   ;;  %v845_v8 = vld [vmem:[%s3672_s17 + $0x80] sm:$0xff]  }
  0x43   : > { %838 = vst [vmem:[%s3677_s30 + $0x30] sm:$0xff] %v837_v6   ;;  %842 = vst [vmem:[%s3677_s30 + $0x38] sm:$0xff] %v841_v7   ;;  %v849_v9 = vld [vmem:[%s3672_s17 + $0x88] sm:$0xff]   ;;  %v853_v10 = vld [vmem:[%s3672_s17 + $0x90] sm:$0xff]  }
  0x44   : > { %846 = vst [vmem:[%s3677_s30 + $0x40] sm:$0xff] %v845_v8   ;;  %v857_v11 = vld [vmem:[%s3672_s17 + $0x98] sm:$0xff]   ;;  %850 = vst [vmem:[%s3677_s30 + $0x48] sm:$0xff] %v849_v9   ;;  %v861_v12 = vld [vmem:[%s3672_s17 + $0xa0] sm:$0xff]  }
  0x45   : > { %854 = vst [vmem:[%s3677_s30 + $0x50] sm:$0xff] %v853_v10   ;;  %858 = vst [vmem:[%s3677_s30 + $0x58] sm:$0xff] %v857_v11   ;;  %v865_v13 = vld [vmem:[%s3672_s17 + $0xa8] sm:$0xff]   ;;  %v869_v14 = vld [vmem:[%s3672_s17 + $0xb0] sm:$0xff]  }
  0x46   : > { %862 = vst [vmem:[%s3677_s30 + $0x60] sm:$0xff] %v861_v12   ;;  %866 = vst [vmem:[%s3677_s30 + $0x68] sm:$0xff] %v865_v13   ;;  %v873_v15 = vld [vmem:[%s3672_s17 + $0xb8] sm:$0xff]   ;;  %v877_v16 = vld [vmem:[%s3672_s17 + $0x100] sm:$0xff]  }
  0x47   : > { %870 = vst [vmem:[%s3677_s30 + $0x70] sm:$0xff] %v869_v14   ;;  %v881_v17 = vld [vmem:[%s3672_s17 + $0x108] sm:$0xff]   ;;  %874 = vst [vmem:[%s3677_s30 + $0x78] sm:$0xff] %v873_v15   ;;  %v885_v18 = vld [vmem:[%s3672_s17 + $0x110] sm:$0xff]  }
  0x48   : > { %878 = vst [vmem:[%s3677_s30 + $0x80] sm:$0xff] %v877_v16   ;;  %882 = vst [vmem:[%s3677_s30 + $0x88] sm:$0xff] %v881_v17   ;;  %v889_v19 = vld [vmem:[%s3672_s17 + $0x118] sm:$0xff]   ;;  %v893_v20 = vld [vmem:[%s3672_s17 + $0x120] sm:$0xff]  }
  0x49   : > { %886 = vst [vmem:[%s3677_s30 + $0x90] sm:$0xff] %v885_v18   ;;  %890 = vst [vmem:[%s3677_s30 + $0x98] sm:$0xff] %v889_v19   ;;  %v897_v21 = vld [vmem:[%s3672_s17 + $0x128] sm:$0xff]   ;;  %v901_v22 = vld [vmem:[%s3672_s17 + $0x130] sm:$0xff]  }
  0x4a   : > { %894 = vst [vmem:[%s3677_s30 + $0xa0] sm:$0xff] %v893_v20   ;;  %v905_v23 = vld [vmem:[%s3672_s17 + $0x138] sm:$0xff]   ;;  %898 = vst [vmem:[%s3677_s30 + $0xa8] sm:$0xff] %v897_v21   ;;  %v909_v24 = vld [vmem:[%s3672_s17 + $0x180] sm:$0xff]  }
  0x4b   : > { %902 = vst [vmem:[%s3677_s30 + $0xb0] sm:$0xff] %v901_v22   ;;  %906 = vst [vmem:[%s3677_s30 + $0xb8] sm:$0xff] %v905_v23   ;;  %v913_v25 = vld [vmem:[%s3672_s17 + $0x188] sm:$0xff]   ;;  %v917_v26 = vld [vmem:[%s3672_s17 + $0x190] sm:$0xff]  }
  0x4c   : > { %910 = vst [vmem:[%s3677_s30 + $0xc0] sm:$0xff] %v909_v24   ;;  %914 = vst [vmem:[%s3677_s30 + $0xc8] sm:$0xff] %v913_v25   ;;  %v921_v27 = vld [vmem:[%s3672_s17 + $0x198] sm:$0xff]   ;;  %v925_v28 = vld [vmem:[%s3672_s17 + $0x1a0] sm:$0xff]  }
  0x4d   : > { %918 = vst [vmem:[%s3677_s30 + $0xd0] sm:$0xff] %v917_v26   ;;  %v929_v29 = vld [vmem:[%s3672_s17 + $0x1a8] sm:$0xff]   ;;  %922 = vst [vmem:[%s3677_s30 + $0xd8] sm:$0xff] %v921_v27   ;;  %v933_v30 = vld [vmem:[%s3672_s17 + $0x1b0] sm:$0xff]  }
  0x4e   : > { %926 = vst [vmem:[%s3677_s30 + $0xe0] sm:$0xff] %v925_v28   ;;  %930 = vst [vmem:[%s3677_s30 + $0xe8] sm:$0xff] %v929_v29   ;;  %v937_v31 = vld [vmem:[%s3672_s17 + $0x1b8] sm:$0xff]   ;;  %v941_v32 = vld [vmem:[%s3672_s17 + $0x200] sm:$0xff]  }
  0x4f   : > { %934 = vst [vmem:[%s3677_s30 + $0xf0] sm:$0xff] %v933_v30   ;;  %938 = vst [vmem:[%s3677_s30 + $0xf8] sm:$0xff] %v937_v31   ;;  %v945_v33 = vld [vmem:[%s3672_s17 + $0x208] sm:$0xff]   ;;  %v949_v34 = vld [vmem:[%s3672_s17 + $0x210] sm:$0xff]  }
  0x50   : > { %942 = vst [vmem:[%s3677_s30 + $0x100] sm:$0xff] %v941_v32   ;;  %v953_v35 = vld [vmem:[%s3672_s17 + $0x218] sm:$0xff]   ;;  %946 = vst [vmem:[%s3677_s30 + $0x108] sm:$0xff] %v945_v33   ;;  %v957_v36 = vld [vmem:[%s3672_s17 + $0x220] sm:$0xff]  }
  0x51   : > { %950 = vst [vmem:[%s3677_s30 + $0x110] sm:$0xff] %v949_v34   ;;  %954 = vst [vmem:[%s3677_s30 + $0x118] sm:$0xff] %v953_v35   ;;  %v961_v37 = vld [vmem:[%s3672_s17 + $0x228] sm:$0xff]   ;;  %v965_v38 = vld [vmem:[%s3672_s17 + $0x230] sm:$0xff]  }
  0x52   : > { %958 = vst [vmem:[%s3677_s30 + $0x120] sm:$0xff] %v957_v36   ;;  %962 = vst [vmem:[%s3677_s30 + $0x128] sm:$0xff] %v961_v37   ;;  %v969_v39 = vld [vmem:[%s3672_s17 + $0x238] sm:$0xff]   ;;  %v973_v40 = vld [vmem:[%s3672_s17 + $0x280] sm:$0xff]  }
  0x53   : > { %966 = vst [vmem:[%s3677_s30 + $0x130] sm:$0xff] %v965_v38   ;;  %v977_v41 = vld [vmem:[%s3672_s17 + $0x288] sm:$0xff]   ;;  %970 = vst [vmem:[%s3677_s30 + $0x138] sm:$0xff] %v969_v39   ;;  %v981_v42 = vld [vmem:[%s3672_s17 + $0x290] sm:$0xff]  }
  0x54   : > { %974 = vst [vmem:[%s3677_s30 + $0x140] sm:$0xff] %v973_v40   ;;  %978 = vst [vmem:[%s3677_s30 + $0x148] sm:$0xff] %v977_v41   ;;  %v985_v43 = vld [vmem:[%s3672_s17 + $0x298] sm:$0xff]   ;;  %v989_v44 = vld [vmem:[%s3672_s17 + $0x2a0] sm:$0xff]  }
  0x55   : > { %982 = vst [vmem:[%s3677_s30 + $0x150] sm:$0xff] %v981_v42   ;;  %986 = vst [vmem:[%s3677_s30 + $0x158] sm:$0xff] %v985_v43   ;;  %v993_v45 = vld [vmem:[%s3672_s17 + $0x2a8] sm:$0xff]   ;;  %v997_v46 = vld [vmem:[%s3672_s17 + $0x2b0] sm:$0xff]  }
  0x56   : > { %990 = vst [vmem:[%s3677_s30 + $0x160] sm:$0xff] %v989_v44   ;;  %v1001_v47 = vld [vmem:[%s3672_s17 + $0x2b8] sm:$0xff]   ;;  %994 = vst [vmem:[%s3677_s30 + $0x168] sm:$0xff] %v993_v45   ;;  %v1005_v48 = vld [vmem:[%s3672_s17 + $0x300] sm:$0xff]  }
  0x57   : > { %998 = vst [vmem:[%s3677_s30 + $0x170] sm:$0xff] %v997_v46   ;;  %1002 = vst [vmem:[%s3677_s30 + $0x178] sm:$0xff] %v1001_v47   ;;  %v1009_v49 = vld [vmem:[%s3672_s17 + $0x308] sm:$0xff]   ;;  %v1013_v50 = vld [vmem:[%s3672_s17 + $0x310] sm:$0xff]  }
  0x58   : > { %1006 = vst [vmem:[%s3677_s30 + $0x180] sm:$0xff] %v1005_v48   ;;  %1010 = vst [vmem:[%s3677_s30 + $0x188] sm:$0xff] %v1009_v49   ;;  %v1017_v51 = vld [vmem:[%s3672_s17 + $0x318] sm:$0xff]   ;;  %v1021_v52 = vld [vmem:[%s3672_s17 + $0x320] sm:$0xff]  }
  0x59   : > { %1014 = vst [vmem:[%s3677_s30 + $0x190] sm:$0xff] %v1013_v50   ;;  %v1025_v53 = vld [vmem:[%s3672_s17 + $0x328] sm:$0xff]   ;;  %1018 = vst [vmem:[%s3677_s30 + $0x198] sm:$0xff] %v1017_v51   ;;  %v1029_v54 = vld [vmem:[%s3672_s17 + $0x330] sm:$0xff]  }
  0x5a   : > { %1022 = vst [vmem:[%s3677_s30 + $0x1a0] sm:$0xff] %v1021_v52   ;;  %1026 = vst [vmem:[%s3677_s30 + $0x1a8] sm:$0xff] %v1025_v53   ;;  %v1033_v55 = vld [vmem:[%s3672_s17 + $0x338] sm:$0xff]   ;;  %v1037_v56 = vld [vmem:[%s3672_s17 + $0x380] sm:$0xff]  }
  0x5b   : > { %1030 = vst [vmem:[%s3677_s30 + $0x1b0] sm:$0xff] %v1029_v54   ;;  %1034 = vst [vmem:[%s3677_s30 + $0x1b8] sm:$0xff] %v1033_v55   ;;  %v1041_v57 = vld [vmem:[%s3672_s17 + $0x388] sm:$0xff]   ;;  %v1045_v58 = vld [vmem:[%s3672_s17 + $0x390] sm:$0xff]  }
  0x5c   : > { %1038 = vst [vmem:[%s3677_s30 + $0x1c0] sm:$0xff] %v1037_v56   ;;  %v1049_v59 = vld [vmem:[%s3672_s17 + $0x398] sm:$0xff]   ;;  %1042 = vst [vmem:[%s3677_s30 + $0x1c8] sm:$0xff] %v1041_v57   ;;  %v1053_v60 = vld [vmem:[%s3672_s17 + $0x3a0] sm:$0xff]  }
  0x5d   : > { %1046 = vst [vmem:[%s3677_s30 + $0x1d0] sm:$0xff] %v1045_v58   ;;  %1050 = vst [vmem:[%s3677_s30 + $0x1d8] sm:$0xff] %v1049_v59   ;;  %v1057_v61 = vld [vmem:[%s3672_s17 + $0x3a8] sm:$0xff]   ;;  %v1061_v62 = vld [vmem:[%s3672_s17 + $0x3b0] sm:$0xff]  }
  0x5e   : > { %1054 = vst [vmem:[%s3677_s30 + $0x1e0] sm:$0xff] %v1053_v60   ;;  %1058 = vst [vmem:[%s3677_s30 + $0x1e8] sm:$0xff] %v1057_v61   ;;  %v1065_v63 = vld [vmem:[%s3672_s17 + $0x3b8] sm:$0xff]  }
  0x5f   : > { %1062 = vst [vmem:[%s3677_s30 + $0x1f0] sm:$0xff] %v1061_v62   ;;  %1066 = vst [vmem:[%s3677_s30 + $0x1f8] sm:$0xff] %v1065_v63  }
  0x60 PF: > { %p2606_p7 = scmp.ge.s32.totalorder %s3425_s27, 1  ;;  %p1360_p8 = scmp.lt.s32.totalorder %s3425_s27, 5 }
  0x62   : > { %p1361_p9 = pnand %p2606_p7, %p1360_p8 }
  0x64   : > { %1364 = sbr.rel (%p1361_p9) target bundleno = 813 (0x32d), region = 118 }
  0x6b   : > { %s1367_s18 = sand.u32 1, %s3401_s21   ;;  %p1418_p10 = scmp.lt.s32.totalorder %s3413_s24, 1 }
  0x6c   : > { %s2607_s19 = sshll.u32 %s1367_s18, 9  ;;  %p2612_p11 = scmp.ne.s32.totalorder %s3409_s23, 0 }
  0x6d   : > { %s5421_s24 = smov (!%p1418_p10, %s3413_s24), 1  ;;  %s3823_s16 = scalar_lea.vmem [#allocation4], %s2607_s19  ;;  %v3427_v0 = vmov (!%p2612_p11), 0.0  }
  0x6e   : > { %s3809_s20 = sshll.u32 %s5421_s24, 3  ;;  %s3825_s17 = scalar_lea.vmem [#allocation5], %s2607_s19  ;;  %1435 = vst [vmem:[#allocation2] sm:$0xff] (!%p2612_p11), %v3427_v0  ;;  %1436 = vst [vmem:[#allocation3] sm:$0xff] (!%p2612_p11), %v3427_v0 }
  0x6f   : > { %s1421_s9 = scalar_lea.vmem %s5000_s2, %s3809_s20  ;;  %s1425_s13 = scalar_lea.vmem %s5001_s3, %s3809_s20 }
  0x70   : > { %s1429_s21 = scalar_lea.vmem %s5004_s6, %s3809_s20  ;;  %1434 = sbr.rel (%p2612_p11) target bundleno = 119 (0x77), region = 130 }
  0x77 PF: > { %v3829_v1 = vld [vmem:[%s3823_s16] sm:$0xff]   ;;  %v3832_v2 = vld [vmem:[%s3823_s16 + $0x8] sm:$0xff]   ;;  %v3839_v7 = vld [vmem:[%s3823_s16 + $0x10] sm:$0xff]   ;;  %vm1870_vm0 = vcmask 1041409   ;;  %vm1872_vm1 = vcmask 1042434   ;;  %vm1874_vm2 = vcmask 1043459  }
  0x78   : > { %v3842_v8 = vld [vmem:[%s3823_s16 + $0x18] sm:$0xff]   ;;  %v3845_v9 = vld [vmem:[%s3823_s16 + $0x20] sm:$0xff]   ;;  %v3852_v14 = vld [vmem:[%s3823_s16 + $0x28] sm:$0xff]   ;;  %vm1876_vm3 = vcmask 1044484   ;;  %vm1878_vm4 = vcmask 1045509   ;;  %vm1880_vm5 = vcmask 1046534  }
  0x79   : > { %v3855_v15 = vld [vmem:[%s3823_s16 + $0x30] sm:$0xff]   ;;  %v3858_v16 = vld [vmem:[%s3823_s16 + $0x38] sm:$0xff]   ;;  %v3865_v21 = vld [vmem:[%s3823_s16 + $0x40] sm:$0xff]   ;;  %vm1882_vm6 = vcmask 1047559   ;;  %p2613_p12 = scmp.ne.s32.totalorder %s3409_s23, 1 }
  0x7a   : > { %5090 = vst [vmem:[#allocation6_spill] sm:$0xff] %v3855_v15  ;;  %5091 = vst [vmem:[#allocation7_spill] sm:$0xff] %v3858_v16  ;;  %v3868_v22 = vld [vmem:[%s3823_s16 + $0x48] sm:$0xff]   ;;  %v3871_v23 = vld [vmem:[%s3823_s16 + $0x50] sm:$0xff]   ;;  %vm3430_vm7 = vmmov (!%p2613_p12), 0   ;;  %vm2472_vm8 = vcmask (!%p2613_p12), 7168  }
  0x7b   : > { %v3878_v28 = vld [vmem:[%s3823_s16 + $0x58] sm:$0xff]   ;;  %v3881_v29 = vld [vmem:[%s3823_s16 + $0x60] sm:$0xff]   ;;  %v3884_v30 = vld [vmem:[%s3823_s16 + $0x68] sm:$0xff]  }
  0x7c   : > { %v3891_v35 = vld [vmem:[%s3823_s16 + $0x70] sm:$0xff]   ;;  %v3894_v36 = vld [vmem:[%s3823_s16 + $0x78] sm:$0xff]   ;;  %v3901_v41 = vld [vmem:[%s3823_s16 + $0x80] sm:$0xff]  }
  0x7d   : > { %5092 = vst [vmem:[#allocation8_spill] sm:$0xff] %v3891_v35  ;;  %5093 = vst [vmem:[#allocation9_spill] sm:$0xff] %v3894_v36  ;;  %v3904_v42 = vld [vmem:[%s3823_s16 + $0x88] sm:$0xff]   ;;  %v3911_v47 = vld [vmem:[%s3823_s16 + $0x90] sm:$0xff]   ;;  %v5116_v35 = vunpack.c.h.bf16 %v3901_v41 }
  0x7e   : > { %v3914_v48 = vld [vmem:[%s3823_s16 + $0x98] sm:$0xff]   ;;  %v3921_v53 = vld [vmem:[%s3823_s16 + $0xa0] sm:$0xff]   ;;  %v3924_v54 = vld [vmem:[%s3823_s16 + $0xa8] sm:$0xff]  }
  0x7f   : > { %v3931_v59 = vld [vmem:[%s3823_s16 + $0xb0] sm:$0xff]   ;;  %v3934_v60 = vld [vmem:[%s3823_s16 + $0xb8] sm:$0xff]   ;;  %v3941_v52 = vld [vmem:[%s3823_s16 + $0xc0] sm:$0xff]  }
  0x80   : > { %5094 = vst [vmem:[#allocation10_spill] sm:$0xff] %v3931_v59  ;;  %5095 = vst [vmem:[#allocation11_spill] sm:$0xff] %v3934_v60  ;;  %v3944_v27 = vld [vmem:[%s3823_s16 + $0xc8] sm:$0xff]   ;;  %v3951_v49 = vld [vmem:[%s3823_s16 + $0xd0] sm:$0xff]   ;;  %v5117_v15 = vunpack.c.l.bf16 %v3941_v52 }
  0x81   : > { %v3954_v24 = vld [vmem:[%s3823_s16 + $0xd8] sm:$0xff]   ;;  %v3961_v26 = vld [vmem:[%s3823_s16 + $0xe0] sm:$0xff]   ;;  %v3964_v44 = vld [vmem:[%s3823_s16 + $0xe8] sm:$0xff]  }
  0x82   : > { %5096 = vst [vmem:[#allocation12_spill] sm:$0xff] %v3964_v44  ;;  %v3971_v20 = vld [vmem:[%s3823_s16 + $0xf0] sm:$0xff]   ;;  %v3974_v51 = vld [vmem:[%s3823_s16 + $0xf8] sm:$0xff]   ;;  %v3981_v0 = vld [vmem:[%s3823_s16 + $0x100] sm:$0xff]  }
  0x83   : > { %5097 = vst [vmem:[#allocation13_spill] sm:$0xff] %v3971_v20  ;;  %5098 = vst [vmem:[#allocation14_spill] sm:$0xff] %v3974_v51  ;;  %v3984_v40 = vld [vmem:[%s3823_s16 + $0x108] sm:$0xff]   ;;  %v3991_v45 = vld [vmem:[%s3823_s16 + $0x110] sm:$0xff]  }
  0x84   : > { %v3994_v62 = vld [vmem:[%s3823_s16 + $0x118] sm:$0xff]   ;;  %v4001_v63 = vld [vmem:[%s3823_s16 + $0x120] sm:$0xff]   ;;  %v4004_v11 = vld [vmem:[%s3823_s16 + $0x128] sm:$0xff]  }
  0x85   : > { %5099 = vst [vmem:[#allocation15_spill] sm:$0xff] %v4004_v11  ;;  %v4011_v43 = vld [vmem:[%s3823_s16 + $0x130] sm:$0xff]   ;;  %v4014_v61 = vld [vmem:[%s3823_s16 + $0x138] sm:$0xff]   ;;  %v4021_v18 = vld [vmem:[%s3823_s16 + $0x140] sm:$0xff]  }
  0x86   : > { %5100 = vst [vmem:[#allocation16_spill] sm:$0xff] %v4011_v43  ;;  %5101 = vst [vmem:[#allocation17_spill] sm:$0xff] %v4014_v61  ;;  %v4024_v58 = vld [vmem:[%s3823_s16 + $0x148] sm:$0xff]   ;;  %v4031_v13 = vld [vmem:[%s3823_s16 + $0x150] sm:$0xff]   ;;  %v5112_v61 = vunpack.c.h.bf16 %v3829_v1 }
  0x87   : > { %v4034_v17 = vld [vmem:[%s3823_s16 + $0x158] sm:$0xff]   ;;  %v4041_v34 = vld [vmem:[%s3823_s16 + $0x160] sm:$0xff]   ;;  %v4044_v57 = vld [vmem:[%s3823_s16 + $0x168] sm:$0xff]  }
  0x88   : > { %5102 = vst [vmem:[#allocation18_spill] sm:$0xff] %v4044_v57  ;;  %v4051_v37 = vld [vmem:[%s3823_s16 + $0x170] sm:$0xff]   ;;  %v4054_v5 = vld [vmem:[%s3823_s16 + $0x178] sm:$0xff]   ;;  %v4061_v38 = vld [vmem:[%s3823_s16 + $0x180] sm:$0xff]   ;;  %v5111_v57 = vunpack.c.l.bf16 %v3829_v1  ;;  %v5120_v1 = vunpack.c.h.bf16 %v3981_v0 }
  0x89   : > { %5103 = vst [vmem:[#allocation19_spill] sm:$0xff] %v4051_v37  ;;  %5104 = vst [vmem:[#allocation20_spill] sm:$0xff] %v4054_v5  ;;  %v4064_v12 = vld [vmem:[%s3823_s16 + $0x188] sm:$0xff]   ;;  %v4071_v19 = vld [vmem:[%s3823_s16 + $0x190] sm:$0xff]   ;;  %v2821_v50 = vunpack.c.l.bf16 %v4061_v38  ;;  %v2822_v46 = vunpack.c.h.bf16 %v4061_v38 }
  0x8a   : > { %v4074_v25 = vld [vmem:[%s3823_s16 + $0x198] sm:$0xff]   ;;  %v4081_v10 = vld [vmem:[%s3823_s16 + $0x1a0] sm:$0xff]   ;;  %v4084_v55 = vld [vmem:[%s3823_s16 + $0x1a8] sm:$0xff]   ;;  %v2825_v39 = vunpack.c.l.bf16 %v4064_v12  ;;  %v2826_v32 = vunpack.c.h.bf16 %v4064_v12  ;;  %v1694_v11 = vadd.f32 %v5112_v61, %v5111_v57  ;;  %v5121_v61 = vunpack.c.l.bf16 %v4021_v18 }
  0x8b   : > { %5105 = vst [vmem:[#allocation21_spill] sm:$0xff] %v4084_v55  ;;  %v4091_v6 = vld [vmem:[%s3823_s16 + $0x1b0] sm:$0xff]   ;;  %v4094_v31 = vld [vmem:[%s3823_s16 + $0x1b8] sm:$0xff]   ;;  %v3194_v38 = vld [vmem:[%s3823_s16 + $0x1c0] sm:$0xff]   ;;  %v5118_v55 = vunpack.c.h.bf16 %v3941_v52 }
  0x8c   : > { %5106 = vst [vmem:[#allocation22_spill] sm:$0xff] %v4091_v6  ;;  %5107 = vst [vmem:[#allocation23_spill] sm:$0xff] %v4094_v31  ;;  %v3195_v5 = vld [vmem:[%s3823_s16 + $0x1c8] sm:$0xff]   ;;  %v4107_v60 = vld [vmem:[%s3823_s16 + $0x1d0] sm:$0xff]   ;;  %v2853_v37 = vunpack.c.l.bf16 %v3194_v38  ;;  %v2854_v51 = vunpack.c.h.bf16 %v3194_v38  ;;  %v5113_v31 = vunpack.c.l.bf16 %v3865_v21  ;;  %v5114_v6 = vunpack.c.h.bf16 %v3865_v21 }
  0x8d   : > { %v4110_v33 = vld [vmem:[%s3823_s16 + $0x1d8] sm:$0xff]   ;;  %v4117_v16 = vld [vmem:[%s3823_s16 + $0x1e0] sm:$0xff]   ;;  %v4120_v12 = vld [vmem:[%s3823_s16 + $0x1e8] sm:$0xff]   ;;  %v2857_v43 = vunpack.c.l.bf16 %v3195_v5  ;;  %v2858_v56 = vunpack.c.h.bf16 %v3195_v5  ;;  %v2861_v4 = vunpack.c.l.bf16 %v4107_v60  ;;  %v2862_v3 = vunpack.c.h.bf16 %v4107_v60 }
  0x8e   : > { %5108 = vst [vmem:[#allocation24_spill] sm:$0xff] %v4120_v12  ;;  %v4123_v20 = vld [vmem:[%s3823_s16 + $0x1f0] sm:$0xff]   ;;  %v4126_v59 = vld [vmem:[%s3823_s16 + $0x1f8] sm:$0xff]   ;;  %v2865_v36 = vunpack.c.l.bf16 %v4110_v33  ;;  %v1715_v38 = vadd.f32 %v5114_v6, %v5113_v31  ;;  %v5115_v5 = vunpack.c.l.bf16 %v3901_v41  ;;  %v1757_v60 = vadd.f32 %v5118_v55, %v5117_v15 }
  0x8f   : > { %5109 = vst [vmem:[#allocation25_spill] sm:$0xff] %v4123_v20  ;;  %5110 = vst [vmem:[#allocation26_spill] sm:$0xff] %v4126_v59  ;;  %v5119_v59 = vunpack.c.l.bf16 %v3981_v0  ;;  %v5122_v21 = vunpack.c.h.bf16 %v4021_v18  ;;  %v1820_v31 = vadd.f32 %v2822_v46, %v2821_v50  ;;  %v1841_v20 = vadd.f32 %v2854_v51, %v2853_v37 }
  0x90   : > { %v1736_v12 = vadd.f32 %v5116_v35, %v5115_v5  ;;  %v5123_v41 = vunpack.c.l.bf16 %v3832_v2  ;;  %v5124_v5 = vunpack.c.l.bf16 %v3868_v22  ;;  %v5125_v15 = vunpack.c.l.bf16 %v3904_v42 }
  0x91   : > { %v1778_v57 = vadd.f32 %v5120_v1, %v5119_v59  ;;  %v1799_v6 = vadd.f32 %v5122_v21, %v5121_v61  ;;  %v5126_v55 = vunpack.c.l.bf16 %v3944_v27  ;;  %v5127_v59 = vunpack.c.l.bf16 %v3984_v40 }
  0x92   : > { %v1695_v35 = vadd.f32 %v5123_v41, %v1694_v11  ;;  %v1716_v44 = vadd.f32 %v5124_v5, %v1715_v38  ;;  %v1737_v52 = vadd.f32 %v5125_v15, %v1736_v12  ;;  %v5128_v18 = vunpack.c.l.bf16 %v4024_v58 }
  0x93   : > { %v1758_v0 = vadd.f32 %v5126_v55, %v1757_v60  ;;  %v1779_v1 = vadd.f32 %v5127_v59, %v1778_v57  ;;  %v1821_v46 = vadd.f32 %v2825_v39, %v1820_v31  ;;  %v1842_v37 = vadd.f32 %v2857_v43, %v1841_v20 }
  0x94   : > { %v1800_v61 = vadd.f32 %v5128_v18, %v1799_v6  ;;  %v5129_v50 = vunpack.c.h.bf16 %v3832_v2  ;;  %v5130_v51 = vunpack.c.h.bf16 %v3868_v22  ;;  %v5131_v21 = vunpack.c.h.bf16 %v3904_v42 }
  0x95   : > { %v5132_v41 = vunpack.c.h.bf16 %v3944_v27  ;;  %v5133_v5 = vunpack.c.h.bf16 %v3984_v40  ;;  %v5134_v15 = vunpack.c.h.bf16 %v4024_v58  ;;  %v1822_v39 = vadd.f32 %v2826_v32, %v1821_v46 }
  0x96   : > { %v1696_v11 = vadd.f32 %v5129_v50, %v1695_v35  ;;  %v1717_v38 = vadd.f32 %v5130_v51, %v1716_v44  ;;  %v1738_v12 = vadd.f32 %v5131_v21, %v1737_v52  ;;  %v1843_v20 = vadd.f32 %v2858_v56, %v1842_v37 }
  0x97   : > { %v1759_v60 = vadd.f32 %v5132_v41, %v1758_v0  ;;  %v1780_v57 = vadd.f32 %v5133_v5, %v1779_v1  ;;  %v1801_v6 = vadd.f32 %v5134_v15, %v1800_v61  ;;  %v5135_v2 = vunpack.c.l.bf16 %v3839_v7 }
  0x98   : > { %v5136_v22 = vunpack.c.l.bf16 %v3871_v23  ;;  %v5137_v42 = vunpack.c.l.bf16 %v3911_v47  ;;  %v5138_v27 = vunpack.c.l.bf16 %v3951_v49  ;;  %v5139_v40 = vunpack.c.l.bf16 %v3991_v45 }
  0x99   : > { %v1697_v43 = vadd.f32 %v5135_v2, %v1696_v11  ;;  %v5140_v58 = vunpack.c.l.bf16 %v4031_v13  ;;  %v5141_v32 = vunpack.c.l.bf16 %v4071_v19  ;;  %v1844_v0 = vadd.f32 %v2861_v4, %v1843_v20 }
  0x9a   : > { %v1718_v44 = vadd.f32 %v5136_v22, %v1717_v38  ;;  %v1739_v31 = vadd.f32 %v5137_v42, %v1738_v12  ;;  %v1760_v35 = vadd.f32 %v5138_v27, %v1759_v60  ;;  %v1781_v52 = vadd.f32 %v5139_v40, %v1780_v57 }
  0x9b   : > { %v1802_v55 = vadd.f32 %v5140_v58, %v1801_v6  ;;  %v1823_v56 = vadd.f32 %v5141_v32, %v1822_v39  ;;  %v5142_v59 = vunpack.c.h.bf16 %v3839_v7  ;;  %v5143_v18 = vunpack.c.h.bf16 %v3871_v23 }
  0x9c   : > { %v5144_v46 = vunpack.c.h.bf16 %v3911_v47  ;;  %v5145_v50 = vunpack.c.h.bf16 %v3951_v49  ;;  %v5146_v51 = vunpack.c.h.bf16 %v3991_v45  ;;  %v5147_v21 = vunpack.c.h.bf16 %v4031_v13 }
  0x9d   : > { %v1698_v1 = vadd.f32 %v5142_v59, %v1697_v43  ;;  %v1719_v61 = vadd.f32 %v5143_v18, %v1718_v44  ;;  %v5148_v4 = vunpack.c.h.bf16 %v4071_v19  ;;  %v1845_v7 = vadd.f32 %v2862_v3, %v1844_v0 }
  0x9e   : > { %v1740_v37 = vadd.f32 %v5144_v46, %v1739_v31  ;;  %v1761_v11 = vadd.f32 %v5145_v50, %v1760_v35  ;;  %v1782_v38 = vadd.f32 %v5146_v51, %v1781_v52  ;;  %v1803_v12 = vadd.f32 %v5147_v21, %v1802_v55 }
  0x9f   : > { %v1824_v41 = vadd.f32 %v5148_v4, %v1823_v56  ;;  %v5149_v60 = vunpack.c.l.bf16 %v3842_v8  ;;  %v5150_v5 = vunpack.c.l.bf16 %v3878_v28  ;;  %v5151_v57 = vunpack.c.l.bf16 %v3914_v48 }
  0xa0   : > { %v5152_v15 = vunpack.c.l.bf16 %v3954_v24  ;;  %v5153_v6 = vunpack.c.l.bf16 %v3994_v62  ;;  %v5154_v39 = vunpack.c.l.bf16 %v4034_v17  ;;  %v5155_v3 = vunpack.c.l.bf16 %v4074_v25 }
  0xa1   : > { %v1699_v23 = vadd.f32 %v5149_v60, %v1698_v1  ;;  %v1720_v47 = vadd.f32 %v5150_v5, %v1719_v61  ;;  %v1741_v49 = vadd.f32 %v5151_v57, %v1740_v37  ;;  %v1846_v2 = vadd.f32 %v2865_v36, %v1845_v7 }
  0xa2   : > { %v1762_v45 = vadd.f32 %v5152_v15, %v1761_v11  ;;  %v1783_v13 = vadd.f32 %v5153_v6, %v1782_v38  ;;  %v1804_v19 = vadd.f32 %v5154_v39, %v1803_v12  ;;  %v1825_v20 = vadd.f32 %v5155_v3, %v1824_v41 }
  0xa3   : > { %v5156_v43 = vunpack.c.h.bf16 %v3842_v8  ;;  %v5157_v44 = vunpack.c.h.bf16 %v3878_v28  ;;  %v5158_v31 = vunpack.c.h.bf16 %v3914_v48  ;;  %v5159_v35 = vunpack.c.h.bf16 %v3954_v24 }
  0xa4   : > { %v5160_v52 = vunpack.c.h.bf16 %v3994_v62  ;;  %v5161_v55 = vunpack.c.h.bf16 %v4034_v17  ;;  %v5162_v36 = vunpack.c.h.bf16 %v4074_v25  ;;  %v5163_v8 = vunpack.c.h.bf16 %v4110_v33 }
  0xa5   : > { %v1700_v22 = vadd.f32 %v5156_v43, %v1699_v23  ;;  %v1721_v42 = vadd.f32 %v5157_v44, %v1720_v47  ;;  %v1742_v27 = vadd.f32 %v5158_v31, %v1741_v49  ;;  %v1763_v40 = vadd.f32 %v5159_v35, %v1762_v45 }
  0xa6   : > { %v1784_v58 = vadd.f32 %v5160_v52, %v1783_v13  ;;  %v1805_v32 = vadd.f32 %v5161_v55, %v1804_v19  ;;  %v1826_v56 = vadd.f32 %v5162_v36, %v1825_v20  ;;  %v1847_v0 = vadd.f32 %v5163_v8, %v1846_v2 }
  0xa7   : > { %v5164_v28 = vunpack.c.l.bf16 %v3845_v9  ;;  %v5165_v48 = vunpack.c.l.bf16 %v3881_v29  ;;  %v5166_v24 = vunpack.c.l.bf16 %v3921_v53  ;;  %v5167_v62 = vunpack.c.l.bf16 %v3961_v26 }
  0xa8   : > { %v5168_v17 = vunpack.c.l.bf16 %v4001_v63  ;;  %v5169_v25 = vunpack.c.l.bf16 %v4041_v34  ;;  %v5170_v33 = vunpack.c.l.bf16 %v4081_v10  ;;  %v5171_v11 = vunpack.c.l.bf16 %v4117_v16 }
  0xa9   : > { %v1701_v59 = vadd.f32 %v5164_v28, %v1700_v22  ;;  %v1722_v1 = vadd.f32 %v5165_v48, %v1721_v42  ;;  %v1743_v18 = vadd.f32 %v5166_v24, %v1742_v27  ;;  %v1764_v61 = vadd.f32 %v5167_v62, %v1763_v40  ;;  %v5191_v27 = vld [vmem:[#allocation24_spill] sm:$0xff] }
  0xaa   : > { %v1785_v46 = vadd.f32 %v5168_v17, %v1784_v58  ;;  %v1806_v37 = vadd.f32 %v5169_v25, %v1805_v32  ;;  %v1827_v50 = vadd.f32 %v5170_v33, %v1826_v56  ;;  %v1848_v51 = vadd.f32 %v5171_v11, %v1847_v0  ;;  %v5207_v11 = vld [vmem:[#allocation13_spill] sm:$0xff] }
  0xab   : > { %v5172_v38 = vunpack.c.h.bf16 %v3845_v9  ;;  %v5173_v12 = vunpack.c.h.bf16 %v3881_v29  ;;  %v5174_v41 = vunpack.c.h.bf16 %v3921_v53  ;;  %v5175_v60 = vunpack.c.h.bf16 %v3961_v26 }
  0xac   : > { %v5176_v5 = vunpack.c.h.bf16 %v4001_v63  ;;  %v5177_v57 = vunpack.c.h.bf16 %v4041_v34  ;;  %v5178_v15 = vunpack.c.h.bf16 %v4081_v10  ;;  %v5179_v9 = vunpack.c.h.bf16 %v4117_v16  ;;  %v5183_v63 = vld [vmem:[#allocation12_spill] sm:$0xff]  ;;  %v5185_v34 = vld [vmem:[#allocation15_spill] sm:$0xff]  ;;  %v5187_v10 = vld [vmem:[#allocation18_spill] sm:$0xff] }
  0xad   : > { %v1702_v21 = vadd.f32 %v5172_v38, %v1701_v59  ;;  %v1723_v4 = vadd.f32 %v5173_v12, %v1722_v1  ;;  %v1744_v7 = vadd.f32 %v5174_v41, %v1743_v18  ;;  %v1765_v23 = vadd.f32 %v5175_v60, %v1764_v61  ;;  %v5189_v16 = vld [vmem:[#allocation21_spill] sm:$0xff]  ;;  %v5211_v41 = vld [vmem:[#allocation19_spill] sm:$0xff] }
  0xae   : > { %v1786_v47 = vadd.f32 %v5176_v5, %v1785_v46  ;;  %v1807_v49 = vadd.f32 %v5177_v57, %v1806_v37  ;;  %v1828_v45 = vadd.f32 %v5178_v15, %v1827_v50  ;;  %v1849_v6 = vadd.f32 %v5179_v9, %v1848_v51  ;;  %v5205_v37 = vld [vmem:[#allocation10_spill] sm:$0xff]  ;;  %v5215_v57 = vld [vmem:[#allocation25_spill] sm:$0xff] }
  0xaf   : > { %v5180_v29 = vunpack.c.l.bf16 %v3852_v14  ;;  %v5181_v53 = vunpack.c.l.bf16 %v3884_v30  ;;  %v5182_v26 = vunpack.c.l.bf16 %v3924_v54  ;;  %v5184_v3 = vunpack.c.l.bf16 %v5183_v63 }
  0xb0   : > { %v5186_v2 = vunpack.c.l.bf16 %v5185_v34  ;;  %v5188_v22 = vunpack.c.l.bf16 %v5187_v10  ;;  %v5190_v42 = vunpack.c.l.bf16 %v5189_v16  ;;  %v5192_v35 = vunpack.c.l.bf16 %v5191_v27 }
  0xb1   : > { %v1703_v13 = vadd.f32 %v5180_v29, %v1702_v21  ;;  %v1724_v39 = vadd.f32 %v5181_v53, %v1723_v4  ;;  %v1745_v19 = vadd.f32 %v5182_v26, %v1744_v7  ;;  %v1766_v20 = vadd.f32 %v5184_v3, %v1765_v23  ;;  %v5209_v21 = vld [vmem:[#allocation16_spill] sm:$0xff]  ;;  %v5213_v23 = vld [vmem:[#allocation22_spill] sm:$0xff] }
  0xb2   : > { %v1787_v43 = vadd.f32 %v5186_v2, %v1786_v47  ;;  %v1808_v44 = vadd.f32 %v5188_v22, %v1807_v49  ;;  %v1829_v31 = vadd.f32 %v5190_v42, %v1828_v45  ;;  %v1850_v40 = vadd.f32 %v5192_v35, %v1849_v6  ;;  %v5225_v22 = vld [vmem:[#allocation7_spill] sm:$0xff]  ;;  %v5227_v42 = vld [vmem:[#allocation9_spill] sm:$0xff] }
  0xb3   : > { %v5193_v52 = vunpack.c.h.bf16 %v3852_v14  ;;  %v5194_v55 = vunpack.c.h.bf16 %v3884_v30  ;;  %v5195_v36 = vunpack.c.h.bf16 %v3924_v54  ;;  %v5196_v8 = vunpack.c.h.bf16 %v5183_v63  ;;  %v5201_v30 = vld [vmem:[#allocation6_spill] sm:$0xff]  ;;  %v5203_v54 = vld [vmem:[#allocation8_spill] sm:$0xff]  ;;  %v5229_v35 = vld [vmem:[#allocation11_spill] sm:$0xff] }
  0xb4   : > { %v5197_v28 = vunpack.c.h.bf16 %v5185_v34  ;;  %v5198_v48 = vunpack.c.h.bf16 %v5187_v10  ;;  %v5199_v24 = vunpack.c.h.bf16 %v5189_v16  ;;  %v5200_v14 = vunpack.c.h.bf16 %v5191_v27 }
  0xb5   : > { %v1704_v58 = vadd.f32 %v5193_v52, %v1703_v13  ;;  %v1725_v32 = vadd.f32 %v5194_v55, %v1724_v39  ;;  %v1746_v56 = vadd.f32 %v5195_v36, %v1745_v19  ;;  %v1767_v0 = vadd.f32 %v5196_v8, %v1766_v20  ;;  %v5233_v36 = vld [vmem:[#allocation17_spill] sm:$0xff] }
  0xb6   : > { %v1788_v59 = vadd.f32 %v5197_v28, %v1787_v43  ;;  %v1809_v1 = vadd.f32 %v5198_v48, %v1808_v44  ;;  %v1830_v18 = vadd.f32 %v5199_v24, %v1829_v31  ;;  %v1851_v62 = vadd.f32 %v5200_v14, %v1850_v40  ;;  %v5237_v48 = vld [vmem:[#allocation23_spill] sm:$0xff] }
  0xb7   : > { %v5202_v61 = vunpack.c.l.bf16 %v5201_v30  ;;  %v5204_v46 = vunpack.c.l.bf16 %v5203_v54  ;;  %v5206_v33 = vunpack.c.l.bf16 %v5205_v37  ;;  %v5208_v51 = vunpack.c.l.bf16 %v5207_v11 }
  0xb8   : > { %v5210_v12 = vunpack.c.l.bf16 %v5209_v21  ;;  %v5212_v7 = vunpack.c.l.bf16 %v5211_v41  ;;  %v5214_v5 = vunpack.c.l.bf16 %v5213_v23  ;;  %v5216_v49 = vunpack.c.l.bf16 %v5215_v57 }
  0xb9   : > { %v1705_v17 = vadd.f32 %v5202_v61, %v1704_v58  ;;  %v1726_v25 = vadd.f32 %v5204_v46, %v1725_v32  ;;  %v1747_v50 = vadd.f32 %v5206_v33, %v1746_v56  ;;  %v1768_v38 = vadd.f32 %v5208_v51, %v1767_v0  ;;  %v5231_v58 = vld [vmem:[#allocation14_spill] sm:$0xff]  ;;  %v5235_v0 = vld [vmem:[#allocation20_spill] sm:$0xff] }
  0xba   : > { %v1789_v4 = vadd.f32 %v5210_v12, %v1788_v59  ;;  %v1810_v60 = vadd.f32 %v5212_v7, %v1809_v1  ;;  %v1831_v47 = vadd.f32 %v5214_v5, %v1830_v18  ;;  %v1852_v15 = vadd.f32 %v5216_v49, %v1851_v62  ;;  %v5239_v18 = vld [vmem:[#allocation26_spill] sm:$0xff] }
  0xbb   : > { %v5217_v45 = vunpack.c.h.bf16 %v5201_v30  ;;  %v5218_v6 = vunpack.c.h.bf16 %v5203_v54  ;;  %v5219_v13 = vunpack.c.h.bf16 %v5205_v37  ;;  %v5220_v39 = vunpack.c.h.bf16 %v5207_v11 }
  0xbc   : > { %v5221_v19 = vunpack.c.h.bf16 %v5209_v21  ;;  %v5222_v3 = vunpack.c.h.bf16 %v5211_v41  ;;  %v5223_v34 = vunpack.c.h.bf16 %v5213_v23  ;;  %v5224_v43 = vunpack.c.h.bf16 %v5215_v57 }
  0xbd   : > { %v1706_v9 = vadd.f32 %v5217_v45, %v1705_v17  ;;  %v1727_v29 = vadd.f32 %v5218_v6, %v1726_v25  ;;  %v1748_v53 = vadd.f32 %v5219_v13, %v1747_v50  ;;  %v1769_v26 = vadd.f32 %v5220_v39, %v1768_v38 }
  0xbe   : > { %v1790_v63 = vadd.f32 %v5221_v19, %v1789_v4  ;;  %v1811_v20 = vadd.f32 %v5222_v3, %v1810_v60  ;;  %v1832_v2 = vadd.f32 %v5223_v34, %v1831_v47  ;;  %v1853_v10 = vadd.f32 %v5224_v43, %v1852_v15 }
  0xbf   : > { %v5226_v44 = vunpack.c.l.bf16 %v5225_v22  ;;  %v5228_v31 = vunpack.c.l.bf16 %v5227_v42  ;;  %v5230_v40 = vunpack.c.l.bf16 %v5229_v35  ;;  %v5232_v55 = vunpack.c.l.bf16 %v5231_v58 }
  0xc0   : > { %v5234_v56 = vunpack.c.l.bf16 %v5233_v36  ;;  %v5236_v28 = vunpack.c.l.bf16 %v5235_v0  ;;  %v5238_v1 = vunpack.c.l.bf16 %v5237_v48  ;;  %v5240_v14 = vunpack.c.l.bf16 %v5239_v18 }
  0xc1   : > { %v1707_v16 = vadd.f32 %v5226_v44, %v1706_v9  ;;  %v1728_v27 = vadd.f32 %v5228_v31, %v1727_v29  ;;  %v1749_v52 = vadd.f32 %v5230_v40, %v1748_v53  ;;  %v1770_v32 = vadd.f32 %v5232_v55, %v1769_v26 }
  0xc2   : > { %v1791_v8 = vadd.f32 %v5234_v56, %v1790_v63  ;;  %v1812_v59 = vadd.f32 %v5236_v28, %v1811_v20  ;;  %v1833_v24 = vadd.f32 %v5238_v1, %v1832_v2  ;;  %v1854_v62 = vadd.f32 %v5240_v14, %v1853_v10 }
  0xc3   : > { %v5241_v30 = vunpack.c.h.bf16 %v5225_v22  ;;  %v5242_v17 = vunpack.c.h.bf16 %v5227_v42  ;;  %v5243_v46 = vunpack.c.h.bf16 %v5229_v35  ;;  %v5244_v37 = vunpack.c.h.bf16 %v5231_v58 }
  0xc4   : > { %v5245_v50 = vunpack.c.h.bf16 %v5233_v36  ;;  %v5246_v51 = vunpack.c.h.bf16 %v5235_v0  ;;  %v5247_v21 = vunpack.c.h.bf16 %v5237_v48  ;;  %v5248_v4 = vunpack.c.h.bf16 %v5239_v18 }
  0xc5   : > { %v1708_v61 = vadd.f32 %v5241_v30, %v1707_v16  ;;  %v1729_v54 = vadd.f32 %v5242_v17, %v1728_v27  ;;  %v1750_v25 = vadd.f32 %v5243_v46, %v1749_v52  ;;  %v1771_v33 = vadd.f32 %v5244_v37, %v1770_v32  ;;  %v4381_v17 = vld [vmem:[%s3825_s17 + $0x10] sm:$0xff]   ;;  %v4385_v46 = vld [vmem:[%s3825_s17 + $0x18] sm:$0xff]  }
  0xc6   : > { %v1792_v11 = vadd.f32 %v5245_v50, %v1791_v8  ;;  %v1813_v38 = vadd.f32 %v5246_v51, %v1812_v59  ;;  %v1834_v12 = vadd.f32 %v5247_v21, %v1833_v24  ;;  %v1855_v41 = vadd.f32 %v5248_v4, %v1854_v62  ;;  %v4375_v24 = vld [vmem:[%s3825_s17] sm:$0xff]   ;;  %v4401_v4 = vld [vmem:[%s3825_s17 + $0x30] sm:$0xff]  }
  0xc7   : > { %v1709_v7 = vrot.slane %v1708_v61, 4  ;;  %v1730_v60 = vrot.slane %v1729_v54, 4  ;;  %v1751_v23 = vrot.slane %v1750_v25, 4  ;;  %v1772_v5 = vrot.slane %v1771_v33, 4  ;;  %v4391_v50 = vld [vmem:[%s3825_s17 + $0x20] sm:$0xff]   ;;  %5249 = vst [vmem:[#allocation12_spill] sm:$0xff] %v4401_v4 }
  0xc8   : > { %v1793_v47 = vrot.slane %v1792_v11, 4  ;;  %v1814_v57 = vrot.slane %v1813_v38, 4  ;;  %v1835_v49 = vrot.slane %v1834_v12, 4  ;;  %v1856_v15 = vrot.slane %v1855_v41, 4  ;;  %v4644_v21 = vld [vmem:[%s3825_s17 + $0x1b0] sm:$0xff]  }
  0xc9   : > { %v1710_v45 = vadd.f32 %v1709_v7, %v1708_v61  ;;  %v1731_v9 = vadd.f32 %v1730_v60, %v1729_v54  ;;  %v1752_v6 = vadd.f32 %v1751_v23, %v1750_v25  ;;  %v1773_v29 = vadd.f32 %v1772_v5, %v1771_v33  ;;  %v4378_v61 = vld [vmem:[%s3825_s17 + $0x8] sm:$0xff]   ;;  %v4408_v5 = vld [vmem:[%s3825_s17 + $0x38] sm:$0xff]   ;;  %v4584_v23 = vld [vmem:[%s3825_s17 + $0x150] sm:$0xff]   ;;  %5265 = vst [vmem:[#allocation14_spill] sm:$0xff] %v4644_v21 }
  0xca   : > { %v1794_v13 = vadd.f32 %v1793_v47, %v1792_v11  ;;  %v1815_v53 = vadd.f32 %v1814_v57, %v1813_v38  ;;  %v1836_v39 = vadd.f32 %v1835_v49, %v1834_v12  ;;  %v1857_v26 = vadd.f32 %v1856_v15, %v1855_v41  ;;  %v4394_v11 = vld [vmem:[%s3825_s17 + $0x28] sm:$0xff]   ;;  %5250 = vst [vmem:[#allocation15_spill] sm:$0xff] %v4408_v5  ;;  %v4411_v47 = vld [vmem:[%s3825_s17 + $0x40] sm:$0xff]   ;;  %v1437_v57 = vld [vmem:[#allocation2] sm:$0xff] }
  0xcb   : > { %v1711_v19 = vrot.slane %v1710_v45, 2  ;;  %v1732_v63 = vrot.slane %v1731_v9, 2  ;;  %v1753_v3 = vrot.slane %v1752_v6, 2  ;;  %v1774_v20 = vrot.slane %v1773_v29, 2  ;;  %v4557_v7 = vld [vmem:[%s3825_s17 + $0x128] sm:$0xff]   ;;  %v4587_v15 = vld [vmem:[%s3825_s17 + $0x158] sm:$0xff]  }
  0xcc   : > { %v1795_v34 = vrot.slane %v1794_v13, 2  ;;  %v1816_v2 = vrot.slane %v1815_v53, 2  ;;  %v1837_v43 = vrot.slane %v1836_v39, 2  ;;  %v1858_v10 = vrot.slane %v1857_v26, 2  ;;  %5258 = vst [vmem:[#allocation16_spill] sm:$0xff] %v4557_v7  ;;  %v4607_v38 = vld [vmem:[%s3825_s17 + $0x178] sm:$0xff]  }
  0xcd   : > { %v1712_v22 = vadd.f32 %v1711_v19, %v1710_v45  ;;  %v1733_v44 = vadd.f32 %v1732_v63, %v1731_v9  ;;  %v1754_v16 = vadd.f32 %v1753_v3, %v1752_v6  ;;  %v1775_v42 = vadd.f32 %v1774_v20, %v1773_v29  ;;  %v4418_v6 = vld [vmem:[%s3825_s17 + $0x48] sm:$0xff]   ;;  %v4428_v19 = vld [vmem:[%s3825_s17 + $0x58] sm:$0xff]   ;;  %v4514_v3 = vld [vmem:[%s3825_s17 + $0xe0] sm:$0xff]   ;;  %5263 = vst [vmem:[#allocation9_spill] sm:$0xff] %v4607_v38 }
  0xce   : > { %v1796_v31 = vadd.f32 %v1795_v34, %v1794_v13  ;;  %v1817_v27 = vadd.f32 %v1816_v2, %v1815_v53  ;;  %v1838_v35 = vadd.f32 %v1837_v43, %v1836_v39  ;;  %v1859_v40 = vadd.f32 %v1858_v10, %v1857_v26  ;;  %v4425_v26 = vld [vmem:[%s3825_s17 + $0x50] sm:$0xff]   ;;  %v4435_v2 = vld [vmem:[%s3825_s17 + $0x60] sm:$0xff]   ;;  %v4438_v43 = vld [vmem:[%s3825_s17 + $0x68] sm:$0xff]  }
  0xcf   : > { %v1713_v52 = vrot.slane %v1712_v22, 1  ;;  %v1734_v58 = vrot.slane %v1733_v44, 1  ;;  %v1755_v55 = vrot.slane %v1754_v16, 1  ;;  %v1776_v32 = vrot.slane %v1775_v42, 1  ;;  %v4497_v20 = vld [vmem:[%s3825_s17 + $0xc8] sm:$0xff]   ;;  %v4507_v53 = vld [vmem:[%s3825_s17 + $0xd8] sm:$0xff]  }
  0xd0   : > { %v1797_v36 = vrot.slane %v1796_v31, 1  ;;  %v1818_v56 = vrot.slane %v1817_v27, 1  ;;  %v1839_v8 = vrot.slane %v1838_v35, 1  ;;  %v1860_v0 = vrot.slane %v1859_v40, 1  ;;  %v4524_v13 = vld [vmem:[%s3825_s17 + $0xf0] sm:$0xff]   ;;  %v4574_v45 = vld [vmem:[%s3825_s17 + $0x140] sm:$0xff]  }
  0xd1   : > { %v1714_v28 = vadd.f32 %v1713_v52, %v1712_v22  ;;  %v1735_v59 = vadd.f32 %v1734_v58, %v1733_v44  ;;  %v1756_v48 = vadd.f32 %v1755_v55, %v1754_v16  ;;  %v1777_v1 = vadd.f32 %v1776_v32, %v1775_v42  ;;  %v4444_v42 = vld [vmem:[%s3825_s17 + $0x70] sm:$0xff]   ;;  %v4454_v58 = vld [vmem:[%s3825_s17 + $0x80] sm:$0xff]   ;;  %v4457_v55 = vld [vmem:[%s3825_s17 + $0x88] sm:$0xff]   ;;  %5256 = vst [vmem:[#allocation10_spill] sm:$0xff] %v4524_v13 }
  0xd2   : > { %v1798_v18 = vadd.f32 %v1797_v36, %v1796_v31  ;;  %v1819_v14 = vadd.f32 %v1818_v56, %v1817_v27  ;;  %v1840_v62 = vadd.f32 %v1839_v8, %v1838_v35  ;;  %v1861_v30 = vadd.f32 %v1860_v0, %v1859_v40  ;;  %5251 = vst [vmem:[#allocation18_spill] sm:$0xff] %v4444_v42  ;;  %v4447_v31 = vld [vmem:[%s3825_s17 + $0x78] sm:$0xff]   ;;  %v4464_v0 = vld [vmem:[%s3825_s17 + $0x90] sm:$0xff]   ;;  %v4517_v36 = vld [vmem:[%s3825_s17 + $0xe8] sm:$0xff]  }
  0xd3   : > { %v1871_v54 = vsel %vm1870_vm0, %v1735_v59, %v1714_v28  ;;  %5252 = vst [vmem:[#allocation21_spill] sm:$0xff] %v4447_v31  ;;  %v4467_v28 = vld [vmem:[%s3825_s17 + $0x98] sm:$0xff]   ;;  %v4504_v59 = vld [vmem:[%s3825_s17 + $0xd0] sm:$0xff]   ;;  %5255 = vst [vmem:[#allocation8_spill] sm:$0xff] %v4517_v36  ;;  %v5273_v21 = vunpack.c.h.bf16 %v4411_v47  ;;  %v5275_v42 = vunpack.c.h.bf16 %v4454_v58 }
  0xd4   : > { %v1873_v25 = vsel %vm1872_vm1, %v1756_v48, %v1871_v54  ;;  %v4537_v52 = vld [vmem:[%s3825_s17 + $0x108] sm:$0xff]   ;;  %v4544_v56 = vld [vmem:[%s3825_s17 + $0x110] sm:$0xff]   ;;  %v4594_v16 = vld [vmem:[%s3825_s17 + $0x160] sm:$0xff]  }
  0xd5   : > { %v1875_v51 = vsel %vm1874_vm2, %v1777_v1, %v1873_v25  ;;  %v4527_v1 = vld [vmem:[%s3825_s17 + $0xf8] sm:$0xff]   ;;  %v4564_v32 = vld [vmem:[%s3825_s17 + $0x130] sm:$0xff]   ;;  %v4597_v25 = vld [vmem:[%s3825_s17 + $0x168] sm:$0xff]  }
  0xd6   : > { %v1877_v41 = vsel %vm1876_vm3, %v1798_v18, %v1875_v51  ;;  %v4494_v18 = vld [vmem:[%s3825_s17 + $0xc0] sm:$0xff]   ;;  %5257 = vst [vmem:[#allocation13_spill] sm:$0xff] %v4527_v1  ;;  %5259 = vst [vmem:[#allocation19_spill] sm:$0xff] %v4564_v32  ;;  %v4577_v51 = vld [vmem:[%s3825_s17 + $0x148] sm:$0xff]  }
  0xd7   : > { %v1879_v49 = vsel %vm1878_vm4, %v1819_v14, %v1877_v41  ;;  %v4474_v14 = vld [vmem:[%s3825_s17 + $0xa0] sm:$0xff]   ;;  %v4484_v41 = vld [vmem:[%s3825_s17 + $0xb0] sm:$0xff]   ;;  %5261 = vst [vmem:[#allocation25_spill] sm:$0xff] %v4597_v25  ;;  %v4617_v60 = vld [vmem:[%s3825_s17 + $0x188] sm:$0xff]   ;;  %v5270_v25 = vunpack.c.l.bf16 %v4375_v24  ;;  %v5276_v4 = vunpack.c.l.bf16 %v4494_v18 }
  0xd8   : > { %v1881_v29 = vsel %vm1880_vm5, %v1840_v62, %v1879_v49  ;;  %v4477_v62 = vld [vmem:[%s3825_s17 + $0xa8] sm:$0xff]   ;;  %5253 = vst [vmem:[#allocation24_spill] sm:$0xff] %v4484_v41  ;;  %v4567_v49 = vld [vmem:[%s3825_s17 + $0x138] sm:$0xff]   ;;  %v4604_v27 = vld [vmem:[%s3825_s17 + $0x170] sm:$0xff]   ;;  %v3081_v40 = vunpack.c.l.bf16 %v4617_v60  ;;  %v3082_v22 = vunpack.c.h.bf16 %v4617_v60 }
  0xd9   : > { %v1883_v63 = vsel %vm1882_vm6, %v1861_v30, %v1881_v29  ;;  %v4547_v29 = vld [vmem:[%s3825_s17 + $0x118] sm:$0xff]   ;;  %5260 = vst [vmem:[#allocation22_spill] sm:$0xff] %v4567_v49  ;;  %5262 = vst [vmem:[#allocation7_spill] sm:$0xff] %v4604_v27  ;;  %v4614_v35 = vld [vmem:[%s3825_s17 + $0x180] sm:$0xff]   ;;  %v5271_v49 = vunpack.c.h.bf16 %v4375_v24 }
  0xda   : > { %v1885_v10 = vadd.f32 %v1883_v63, %v1437_v57  ;;  %v4487_v57 = vld [vmem:[%s3825_s17 + $0xb8] sm:$0xff]   ;;  %v4554_v63 = vld [vmem:[%s3825_s17 + $0x120] sm:$0xff]   ;;  %v4624_v9 = vld [vmem:[%s3825_s17 + $0x190] sm:$0xff]   ;;  %v3077_v48 = vunpack.c.l.bf16 %v4614_v35  ;;  %v3078_v8 = vunpack.c.h.bf16 %v4614_v35 }
  0xdb   : > { %5254 = vst [vmem:[#allocation6_spill] sm:$0xff] %v4487_v57  ;;  %v4627_v39 = vld [vmem:[%s3825_s17 + $0x198] sm:$0xff]   ;;  %v4634_v12 = vld [vmem:[%s3825_s17 + $0x1a0] sm:$0xff]   ;;  %v4637_v30 = vld [vmem:[%s3825_s17 + $0x1a8] sm:$0xff]   ;;  %v2144_v7 = vadd.f32 %v5271_v49, %v5270_v25  ;;  %v5280_v49 = vunpack.c.l.bf16 %v4574_v45 }
  0xdc   : > { %1886 = vst [vmem:[#allocation2] sm:$0xff] %v1885_v10  ;;  %v4534_v10 = vld [vmem:[%s3825_s17 + $0x100] sm:$0xff]   ;;  %5264 = vst [vmem:[#allocation11_spill] sm:$0xff] %v4637_v30  ;;  %v4647_v34 = vld [vmem:[%s3825_s17 + $0x1b8] sm:$0xff]   ;;  %v5277_v30 = vunpack.c.h.bf16 %v4494_v18 }
  0xdd   : > { %5266 = vst [vmem:[#allocation17_spill] sm:$0xff] %v4647_v34  ;;  %v3257_v35 = vld [vmem:[%s3825_s17 + $0x1c0] sm:$0xff]   ;;  %v3258_v38 = vld [vmem:[%s3825_s17 + $0x1c8] sm:$0xff]   ;;  %v4660_v57 = vld [vmem:[%s3825_s17 + $0x1d0] sm:$0xff]   ;;  %v5272_v34 = vunpack.c.l.bf16 %v4411_v47  ;;  %v5279_v24 = vunpack.c.h.bf16 %v4534_v10  ;;  %v5281_v47 = vunpack.c.h.bf16 %v4574_v45  ;;  %v5287_v45 = vunpack.c.l.bf16 %v4577_v51 }
  0xde   : > { %v4663_v44 = vld [vmem:[%s3825_s17 + $0x1d8] sm:$0xff]   ;;  %v4670_v5 = vld [vmem:[%s3825_s17 + $0x1e0] sm:$0xff]   ;;  %v4673_v60 = vld [vmem:[%s3825_s17 + $0x1e8] sm:$0xff]   ;;  %v3109_v27 = vunpack.c.l.bf16 %v3257_v35  ;;  %v3110_v1 = vunpack.c.h.bf16 %v3257_v35  ;;  %v3113_v32 = vunpack.c.l.bf16 %v3258_v38  ;;  %v3114_v54 = vunpack.c.h.bf16 %v3258_v38 }
  0xdf   : > { %5267 = vst [vmem:[#allocation20_spill] sm:$0xff] %v4673_v60  ;;  %v4676_v13 = vld [vmem:[%s3825_s17 + $0x1f0] sm:$0xff]   ;;  %v4679_v41 = vld [vmem:[%s3825_s17 + $0x1f8] sm:$0xff]   ;;  %v3117_v33 = vunpack.c.l.bf16 %v4660_v57  ;;  %v3118_v37 = vunpack.c.h.bf16 %v4660_v57  ;;  %v3121_v31 = vunpack.c.l.bf16 %v4663_v44  ;;  %v2165_v35 = vadd.f32 %v5273_v21, %v5272_v34 }
  0xe0   : > { %5268 = vst [vmem:[#allocation23_spill] sm:$0xff] %v4676_v13  ;;  %5269 = vst [vmem:[#allocation26_spill] sm:$0xff] %v4679_v41  ;;  %v5274_v38 = vunpack.c.l.bf16 %v4454_v58  ;;  %v2207_v57 = vadd.f32 %v5277_v30, %v5276_v4  ;;  %v5278_v41 = vunpack.c.l.bf16 %v4534_v10  ;;  %v2249_v21 = vadd.f32 %v5281_v47, %v5280_v49 }
  0xe1   : > { %v2270_v34 = vadd.f32 %v3078_v8, %v3077_v48  ;;  %v2291_v13 = vadd.f32 %v3110_v1, %v3109_v27  ;;  %v5282_v58 = vunpack.c.l.bf16 %v4378_v61  ;;  %v5284_v4 = vunpack.c.l.bf16 %v4457_v55 }
  0xe2   : > { %v2186_v60 = vadd.f32 %v5275_v42, %v5274_v38  ;;  %v2228_v25 = vadd.f32 %v5279_v24, %v5278_v41  ;;  %v5283_v38 = vunpack.c.l.bf16 %v4418_v6  ;;  %v5285_v30 = vunpack.c.l.bf16 %v4497_v20 }
  0xe3   : > { %v2145_v42 = vadd.f32 %v5282_v58, %v2144_v7  ;;  %v5286_v41 = vunpack.c.l.bf16 %v4537_v52  ;;  %v2250_v49 = vadd.f32 %v5287_v45, %v2249_v21  ;;  %v2271_v8 = vadd.f32 %v3081_v40, %v2270_v34 }
  0xe4   : > { %v2166_v36 = vadd.f32 %v5283_v38, %v2165_v35  ;;  %v2187_v18 = vadd.f32 %v5284_v4, %v2186_v60  ;;  %v2208_v10 = vadd.f32 %v5285_v30, %v2207_v57  ;;  %v2292_v27 = vadd.f32 %v3113_v32, %v2291_v13 }
  0xe5   : > { %v2229_v24 = vadd.f32 %v5286_v41, %v2228_v25  ;;  %v5288_v48 = vunpack.c.h.bf16 %v4378_v61  ;;  %v5289_v1 = vunpack.c.h.bf16 %v4418_v6  ;;  %v5290_v47 = vunpack.c.h.bf16 %v4457_v55 }
  0xe6   : > { %v5291_v58 = vunpack.c.h.bf16 %v4497_v20  ;;  %v5292_v38 = vunpack.c.h.bf16 %v4537_v52  ;;  %v5293_v4 = vunpack.c.h.bf16 %v4577_v51  ;;  %v2272_v40 = vadd.f32 %v3082_v22, %v2271_v8 }
  0xe7   : > { %v2146_v7 = vadd.f32 %v5288_v48, %v2145_v42  ;;  %v2167_v35 = vadd.f32 %v5289_v1, %v2166_v36  ;;  %v2188_v60 = vadd.f32 %v5290_v47, %v2187_v18  ;;  %v2293_v13 = vadd.f32 %v3114_v54, %v2292_v27 }
  0xe8   : > { %v2209_v57 = vadd.f32 %v5291_v58, %v2208_v10  ;;  %v2230_v25 = vadd.f32 %v5292_v38, %v2229_v24  ;;  %v2251_v21 = vadd.f32 %v5293_v4, %v2250_v49  ;;  %v5294_v61 = vunpack.c.l.bf16 %v4381_v17 }
  0xe9   : > { %v5295_v6 = vunpack.c.l.bf16 %v4425_v26  ;;  %v5296_v55 = vunpack.c.l.bf16 %v4464_v0  ;;  %v5297_v20 = vunpack.c.l.bf16 %v4504_v59  ;;  %v5298_v52 = vunpack.c.l.bf16 %v4544_v56 }
  0xea   : > { %v2147_v32 = vadd.f32 %v5294_v61, %v2146_v7  ;;  %v5299_v51 = vunpack.c.l.bf16 %v4584_v23  ;;  %v5300_v22 = vunpack.c.l.bf16 %v4624_v9  ;;  %v2294_v10 = vadd.f32 %v3117_v33, %v2293_v13 }
  0xeb   : > { %v2168_v36 = vadd.f32 %v5295_v6, %v2167_v35  ;;  %v2189_v34 = vadd.f32 %v5296_v55, %v2188_v60  ;;  %v2210_v42 = vadd.f32 %v5297_v20, %v2209_v57  ;;  %v2231_v18 = vadd.f32 %v5298_v52, %v2230_v25 }
  0xec   : > { %v2252_v30 = vadd.f32 %v5299_v51, %v2251_v21  ;;  %v2273_v54 = vadd.f32 %v5300_v22, %v2272_v40  ;;  %v5301_v41 = vunpack.c.h.bf16 %v4381_v17  ;;  %v5302_v45 = vunpack.c.h.bf16 %v4425_v26 }
  0xed   : > { %v5303_v8 = vunpack.c.h.bf16 %v4464_v0  ;;  %v5304_v48 = vunpack.c.h.bf16 %v4504_v59  ;;  %v5305_v1 = vunpack.c.h.bf16 %v4544_v56  ;;  %v5306_v47 = vunpack.c.h.bf16 %v4584_v23 }
  0xee   : > { %v2148_v24 = vadd.f32 %v5301_v41, %v2147_v32  ;;  %v2169_v49 = vadd.f32 %v5302_v45, %v2168_v36  ;;  %v5307_v33 = vunpack.c.h.bf16 %v4624_v9  ;;  %v2295_v17 = vadd.f32 %v3118_v37, %v2294_v10 }
  0xef   : > { %v2190_v27 = vadd.f32 %v5303_v8, %v2189_v34  ;;  %v2211_v7 = vadd.f32 %v5304_v48, %v2210_v42  ;;  %v2232_v35 = vadd.f32 %v5305_v1, %v2231_v18  ;;  %v2253_v60 = vadd.f32 %v5306_v47, %v2252_v30 }
  0xf0   : > { %v2274_v58 = vadd.f32 %v5307_v33, %v2273_v54  ;;  %v5308_v57 = vunpack.c.l.bf16 %v4385_v46  ;;  %v5309_v38 = vunpack.c.l.bf16 %v4428_v19  ;;  %v5310_v25 = vunpack.c.l.bf16 %v4467_v28 }
  0xf1   : > { %v5311_v4 = vunpack.c.l.bf16 %v4507_v53  ;;  %v5312_v21 = vunpack.c.l.bf16 %v4547_v29  ;;  %v5313_v40 = vunpack.c.l.bf16 %v4587_v15  ;;  %v5314_v37 = vunpack.c.l.bf16 %v4627_v39 }
  0xf2   : > { %v2149_v26 = vadd.f32 %v5308_v57, %v2148_v24  ;;  %v2170_v0 = vadd.f32 %v5309_v38, %v2169_v49  ;;  %v2191_v59 = vadd.f32 %v5310_v25, %v2190_v27  ;;  %v2296_v61 = vadd.f32 %v3121_v31, %v2295_v17 }
  0xf3   : > { %v2212_v56 = vadd.f32 %v5311_v4, %v2211_v7  ;;  %v2233_v23 = vadd.f32 %v5312_v21, %v2232_v35  ;;  %v2254_v9 = vadd.f32 %v5313_v40, %v2253_v60  ;;  %v2275_v13 = vadd.f32 %v5314_v37, %v2274_v58 }
  0xf4   : > { %v5315_v32 = vunpack.c.h.bf16 %v4385_v46  ;;  %v5316_v36 = vunpack.c.h.bf16 %v4428_v19  ;;  %v5317_v34 = vunpack.c.h.bf16 %v4467_v28  ;;  %v5318_v42 = vunpack.c.h.bf16 %v4507_v53 }
  0xf5   : > { %v5319_v18 = vunpack.c.h.bf16 %v4547_v29  ;;  %v5320_v30 = vunpack.c.h.bf16 %v4587_v15  ;;  %v5321_v31 = vunpack.c.h.bf16 %v4627_v39  ;;  %v5322_v46 = vunpack.c.h.bf16 %v4663_v44 }
  0xf6   : > { %v2150_v6 = vadd.f32 %v5315_v32, %v2149_v26  ;;  %v2171_v55 = vadd.f32 %v5316_v36, %v2170_v0  ;;  %v2192_v20 = vadd.f32 %v5317_v34, %v2191_v59  ;;  %v2213_v52 = vadd.f32 %v5318_v42, %v2212_v56 }
  0xf7   : > { %v2234_v51 = vadd.f32 %v5319_v18, %v2233_v23  ;;  %v2255_v22 = vadd.f32 %v5320_v30, %v2254_v9  ;;  %v2276_v54 = vadd.f32 %v5321_v31, %v2275_v13  ;;  %v2297_v10 = vadd.f32 %v5322_v46, %v2296_v61 }
  0xf8   : > { %v5323_v19 = vunpack.c.l.bf16 %v4391_v50  ;;  %v5324_v28 = vunpack.c.l.bf16 %v4435_v2  ;;  %v5325_v53 = vunpack.c.l.bf16 %v4474_v14  ;;  %v5326_v29 = vunpack.c.l.bf16 %v4514_v3 }
  0xf9   : > { %v5327_v15 = vunpack.c.l.bf16 %v4554_v63  ;;  %v5328_v39 = vunpack.c.l.bf16 %v4594_v16  ;;  %v5329_v44 = vunpack.c.l.bf16 %v4634_v12  ;;  %v5330_v7 = vunpack.c.l.bf16 %v4670_v5 }
  0xfa   : > { %v2151_v41 = vadd.f32 %v5323_v19, %v2150_v6  ;;  %v2172_v24 = vadd.f32 %v5324_v28, %v2171_v55  ;;  %v2193_v45 = vadd.f32 %v5325_v53, %v2192_v20  ;;  %v2214_v49 = vadd.f32 %v5326_v29, %v2213_v52  ;;  %v5350_v20 = vld [vmem:[#allocation20_spill] sm:$0xff] }
  0xfb   : > { %v2235_v8 = vadd.f32 %v5327_v15, %v2234_v51  ;;  %v2256_v27 = vadd.f32 %v5328_v39, %v2255_v22  ;;  %v2277_v48 = vadd.f32 %v5329_v44, %v2276_v54  ;;  %v2298_v1 = vadd.f32 %v5330_v7, %v2297_v10  ;;  %v5366_v7 = vld [vmem:[#allocation10_spill] sm:$0xff] }
  0xfc   : > { %v5331_v35 = vunpack.c.h.bf16 %v4391_v50  ;;  %v5332_v60 = vunpack.c.h.bf16 %v4435_v2  ;;  %v5333_v58 = vunpack.c.h.bf16 %v4474_v14  ;;  %v5334_v57 = vunpack.c.h.bf16 %v4514_v3 }
  0xfd   : > { %v5335_v38 = vunpack.c.h.bf16 %v4554_v63  ;;  %v5336_v25 = vunpack.c.h.bf16 %v4594_v16  ;;  %v5337_v4 = vunpack.c.h.bf16 %v4634_v12  ;;  %v5338_v50 = vunpack.c.h.bf16 %v4670_v5  ;;  %v5342_v63 = vld [vmem:[#allocation8_spill] sm:$0xff]  ;;  %v5346_v12 = vld [vmem:[#allocation25_spill] sm:$0xff]  ;;  %v5348_v5 = vld [vmem:[#allocation11_spill] sm:$0xff] }
  0xfe   : > { %v2152_v47 = vadd.f32 %v5331_v35, %v2151_v41  ;;  %v2173_v33 = vadd.f32 %v5332_v60, %v2172_v24  ;;  %v2194_v17 = vadd.f32 %v5333_v58, %v2193_v45  ;;  %v2215_v26 = vadd.f32 %v5334_v57, %v2214_v49  ;;  %v5344_v16 = vld [vmem:[#allocation16_spill] sm:$0xff]  ;;  %v5370_v58 = vld [vmem:[#allocation7_spill] sm:$0xff] }
  0xff   : > { %v2236_v0 = vadd.f32 %v5335_v38, %v2235_v8  ;;  %v2257_v59 = vadd.f32 %v5336_v25, %v2256_v27  ;;  %v2278_v56 = vadd.f32 %v5337_v4, %v2277_v48  ;;  %v2299_v21 = vadd.f32 %v5338_v50, %v2298_v1  ;;  %v5364_v27 = vld [vmem:[#allocation24_spill] sm:$0xff]  ;;  %v5374_v25 = vld [vmem:[#allocation23_spill] sm:$0xff] }
 0x100   : > { %v5339_v2 = vunpack.c.l.bf16 %v4394_v11  ;;  %v5340_v14 = vunpack.c.l.bf16 %v4438_v43  ;;  %v5341_v3 = vunpack.c.l.bf16 %v4477_v62  ;;  %v5343_v37 = vunpack.c.l.bf16 %v5342_v63 }
 0x101   : > { %v5345_v61 = vunpack.c.l.bf16 %v5344_v16  ;;  %v5347_v6 = vunpack.c.l.bf16 %v5346_v12  ;;  %v5349_v55 = vunpack.c.l.bf16 %v5348_v5  ;;  %v5351_v42 = vunpack.c.l.bf16 %v5350_v20 }
 0x102   : > { %v2153_v23 = vadd.f32 %v5339_v2, %v2152_v47  ;;  %v2174_v40 = vadd.f32 %v5340_v14, %v2173_v33  ;;  %v2195_v9 = vadd.f32 %v5341_v3, %v2194_v17  ;;  %v2216_v13 = vadd.f32 %v5343_v37, %v2215_v26  ;;  %v5368_v47 = vld [vmem:[#allocation19_spill] sm:$0xff]  ;;  %v5372_v26 = vld [vmem:[#allocation14_spill] sm:$0xff] }
 0x103   : > { %v2237_v32 = vadd.f32 %v5345_v61, %v2236_v0  ;;  %v2258_v36 = vadd.f32 %v5347_v6, %v2257_v59  ;;  %v2279_v34 = vadd.f32 %v5349_v55, %v2278_v56  ;;  %v2300_v52 = vadd.f32 %v5351_v42, %v2299_v21  ;;  %v5384_v6 = vld [vmem:[#allocation15_spill] sm:$0xff]  ;;  %v5386_v55 = vld [vmem:[#allocation21_spill] sm:$0xff]  ;;  %v5388_v42 = vld [vmem:[#allocation6_spill] sm:$0xff] }
 0x104   : > { %v5352_v18 = vunpack.c.h.bf16 %v4394_v11  ;;  %v5353_v30 = vunpack.c.h.bf16 %v4438_v43  ;;  %v5354_v31 = vunpack.c.h.bf16 %v4477_v62  ;;  %v5355_v46 = vunpack.c.h.bf16 %v5342_v63  ;;  %v5360_v43 = vld [vmem:[#allocation12_spill] sm:$0xff]  ;;  %v5362_v62 = vld [vmem:[#allocation18_spill] sm:$0xff] }
 0x105   : > { %v5356_v19 = vunpack.c.h.bf16 %v5344_v16  ;;  %v5357_v28 = vunpack.c.h.bf16 %v5346_v12  ;;  %v5358_v53 = vunpack.c.h.bf16 %v5348_v5  ;;  %v5359_v11 = vunpack.c.h.bf16 %v5350_v20 }
 0x106   : > { %v2154_v51 = vadd.f32 %v5352_v18, %v2153_v23  ;;  %v2175_v22 = vadd.f32 %v5353_v30, %v2174_v40  ;;  %v2196_v54 = vadd.f32 %v5354_v31, %v2195_v9  ;;  %v2217_v10 = vadd.f32 %v5355_v46, %v2216_v13  ;;  %v5392_v31 = vld [vmem:[#allocation22_spill] sm:$0xff] }
 0x107   : > { %v2238_v41 = vadd.f32 %v5356_v19, %v2237_v32  ;;  %v2259_v24 = vadd.f32 %v5357_v28, %v2258_v36  ;;  %v2280_v45 = vadd.f32 %v5358_v53, %v2279_v34  ;;  %v2301_v29 = vadd.f32 %v5359_v11, %v2300_v52  ;;  %v5396_v28 = vld [vmem:[#allocation17_spill] sm:$0xff] }
 0x108   : > { %v5361_v49 = vunpack.c.l.bf16 %v5360_v43  ;;  %v5363_v8 = vunpack.c.l.bf16 %v5362_v62  ;;  %v5365_v44 = vunpack.c.l.bf16 %v5364_v27  ;;  %v5367_v1 = vunpack.c.l.bf16 %v5366_v7 }
 0x109   : > { %v5369_v60 = vunpack.c.l.bf16 %v5368_v47  ;;  %v5371_v17 = vunpack.c.l.bf16 %v5370_v58  ;;  %v5373_v38 = vunpack.c.l.bf16 %v5372_v26  ;;  %v5375_v59 = vunpack.c.l.bf16 %v5374_v25 }
 0x10a   : > { %v2155_v15 = vadd.f32 %v5361_v49, %v2154_v51  ;;  %v2176_v39 = vadd.f32 %v5363_v8, %v2175_v22  ;;  %v2197_v48 = vadd.f32 %v5365_v44, %v2196_v54  ;;  %v2218_v35 = vadd.f32 %v5367_v1, %v2217_v10  ;;  %v5390_v51 = vld [vmem:[#allocation13_spill] sm:$0xff] }
 0x10b   : > { %v2239_v33 = vadd.f32 %v5369_v60, %v2238_v41  ;;  %v2260_v57 = vadd.f32 %v5371_v17, %v2259_v24  ;;  %v2281_v0 = vadd.f32 %v5373_v38, %v2280_v45  ;;  %v2302_v4 = vadd.f32 %v5375_v59, %v2301_v29  ;;  %v5394_v10 = vld [vmem:[#allocation9_spill] sm:$0xff]  ;;  %v5398_v45 = vld [vmem:[#allocation26_spill] sm:$0xff] }
 0x10c   : > { %v5376_v56 = vunpack.c.h.bf16 %v5360_v43  ;;  %v5377_v21 = vunpack.c.h.bf16 %v5362_v62  ;;  %v5378_v23 = vunpack.c.h.bf16 %v5364_v27  ;;  %v5379_v40 = vunpack.c.h.bf16 %v5366_v7 }
 0x10d   : > { %v5380_v9 = vunpack.c.h.bf16 %v5368_v47  ;;  %v5381_v37 = vunpack.c.h.bf16 %v5370_v58  ;;  %v5382_v16 = vunpack.c.h.bf16 %v5372_v26  ;;  %v5383_v32 = vunpack.c.h.bf16 %v5374_v25 }
 0x10e   : > { %v2156_v50 = vadd.f32 %v5376_v56, %v2155_v15  ;;  %v2177_v2 = vadd.f32 %v5377_v21, %v2176_v39  ;;  %v2198_v14 = vadd.f32 %v5378_v23, %v2197_v48  ;;  %v2219_v3 = vadd.f32 %v5379_v40, %v2218_v35 }
 0x10f   : > { %v2240_v63 = vadd.f32 %v5380_v9, %v2239_v33  ;;  %v2261_v13 = vadd.f32 %v5381_v37, %v2260_v57  ;;  %v2282_v61 = vadd.f32 %v5382_v16, %v2281_v0  ;;  %v2303_v12 = vadd.f32 %v5383_v32, %v2302_v4 }
 0x110   : > { %v5385_v36 = vunpack.c.l.bf16 %v5384_v6  ;;  %v5387_v34 = vunpack.c.l.bf16 %v5386_v55  ;;  %v5389_v52 = vunpack.c.l.bf16 %v5388_v42  ;;  %v5391_v30 = vunpack.c.l.bf16 %v5390_v51 }
 0x111   : > { %v5393_v54 = vunpack.c.l.bf16 %v5392_v31  ;;  %v5395_v19 = vunpack.c.l.bf16 %v5394_v10  ;;  %v5397_v24 = vunpack.c.l.bf16 %v5396_v28  ;;  %v5399_v11 = vunpack.c.l.bf16 %v5398_v45 }
 0x112   : > { %v2157_v5 = vadd.f32 %v5385_v36, %v2156_v50  ;;  %v2178_v20 = vadd.f32 %v5387_v34, %v2177_v2  ;;  %v2199_v18 = vadd.f32 %v5389_v52, %v2198_v14  ;;  %v2220_v22 = vadd.f32 %v5391_v30, %v2219_v3 }
 0x113   : > { %v2241_v46 = vadd.f32 %v5393_v54, %v2240_v63  ;;  %v2262_v41 = vadd.f32 %v5395_v19, %v2261_v13  ;;  %v2283_v53 = vadd.f32 %v5397_v24, %v2282_v61  ;;  %v2304_v29 = vadd.f32 %v5399_v11, %v2303_v12 }
 0x114   : > { %v5400_v43 = vunpack.c.h.bf16 %v5384_v6  ;;  %v5401_v15 = vunpack.c.h.bf16 %v5386_v55  ;;  %v5402_v8 = vunpack.c.h.bf16 %v5388_v42  ;;  %v5403_v27 = vunpack.c.h.bf16 %v5390_v51 }
 0x115   : > { %v5404_v48 = vunpack.c.h.bf16 %v5392_v31  ;;  %v5405_v1 = vunpack.c.h.bf16 %v5394_v10  ;;  %v5406_v47 = vunpack.c.h.bf16 %v5396_v28  ;;  %v5407_v33 = vunpack.c.h.bf16 %v5398_v45 }
 0x116   : > { %v2158_v49 = vadd.f32 %v5400_v43, %v2157_v5  ;;  %v2179_v62 = vadd.f32 %v5401_v15, %v2178_v20  ;;  %v2200_v39 = vadd.f32 %v5402_v8, %v2199_v18  ;;  %v2221_v44 = vadd.f32 %v5403_v27, %v2220_v22  ;;  %v1887_v8 = vld [vmem:[#allocation3] sm:$0xff] }
 0x117   : > { %v2242_v7 = vadd.f32 %v5404_v48, %v2241_v46  ;;  %v2263_v35 = vadd.f32 %v5405_v1, %v2262_v41  ;;  %v2284_v60 = vadd.f32 %v5406_v47, %v2283_v53  ;;  %v2305_v58 = vadd.f32 %v5407_v33, %v2304_v29  ;;  %v2337_v1 = vld [vmem:[%s1425_s13] sm:$0xff] (!%p2613_p12) }
 0x118   : > { %v2159_v17 = vrot.slane %v2158_v49, 4  ;;  %v2180_v57 = vrot.slane %v2179_v62, 4  ;;  %v2201_v26 = vrot.slane %v2200_v39, 4  ;;  %v2222_v38 = vrot.slane %v2221_v44, 4 }
 0x119   : > { %v2243_v0 = vrot.slane %v2242_v7, 4  ;;  %v2264_v25 = vrot.slane %v2263_v35, 4  ;;  %v2285_v59 = vrot.slane %v2284_v60, 4  ;;  %v2306_v4 = vrot.slane %v2305_v58, 4 }
 0x11a   : > { %v2160_v56 = vadd.f32 %v2159_v17, %v2158_v49  ;;  %v2181_v50 = vadd.f32 %v2180_v57, %v2179_v62  ;;  %v2202_v21 = vadd.f32 %v2201_v26, %v2200_v39  ;;  %v2223_v2 = vadd.f32 %v2222_v38, %v2221_v44  ;;  %v3356_v17 = vld [vmem:[%s5002_s4 + $0x8] sm:$0xff] (!%p2613_p12)   ;;  %v3357_v57 = vld [vmem:[%s5002_s4 + $0x10] sm:$0xff] (!%p2613_p12)   ;;  %v3358_v26 = vld [vmem:[%s5002_s4 + $0x18] sm:$0xff] (!%p2613_p12)  }
 0x11b   : > { %v2244_v23 = vadd.f32 %v2243_v0, %v2242_v7  ;;  %v2265_v14 = vadd.f32 %v2264_v25, %v2263_v35  ;;  %v2286_v40 = vadd.f32 %v2285_v59, %v2284_v60  ;;  %v2307_v3 = vadd.f32 %v2306_v4, %v2305_v58  ;;  %v2334_v7 = vld [vmem:[%s1421_s9] sm:$0xff] (!%p2613_p12)  ;;  %v3360_v59 = vld [vmem:[%s5002_s4 + $0x28] sm:$0xff] (!%p2613_p12)   ;;  %v3361_v4 = vld [vmem:[%s5002_s4 + $0x30] sm:$0xff] (!%p2613_p12)  }
 0x11c   : > { %v2161_v9 = vrot.slane %v2160_v56, 2  ;;  %v2182_v63 = vrot.slane %v2181_v50, 2  ;;  %v2203_v37 = vrot.slane %v2202_v21, 2  ;;  %v2224_v13 = vrot.slane %v2223_v2, 2  ;;  %v3355_v58 = vld [vmem:[%s5002_s4] sm:$0xff] (!%p2613_p12)  }
 0x11d   : > { %v2245_v16 = vrot.slane %v2244_v23, 2  ;;  %v2266_v61 = vrot.slane %v2265_v14, 2  ;;  %v2287_v32 = vrot.slane %v2286_v40, 2  ;;  %v2308_v12 = vrot.slane %v2307_v3, 2  ;;  %v3359_v25 = vld [vmem:[%s5002_s4 + $0x20] sm:$0xff] (!%p2613_p12)  }
 0x11e   : > { %v2162_v6 = vadd.f32 %v2161_v9, %v2160_v56  ;;  %v2183_v36 = vadd.f32 %v2182_v63, %v2181_v50  ;;  %v2204_v5 = vadd.f32 %v2203_v37, %v2202_v21  ;;  %v2225_v55 = vadd.f32 %v2224_v13, %v2223_v2  ;;  %v3362_v56 = vld [vmem:[%s5002_s4 + $0x38] sm:$0xff] (!%p2613_p12)   ;;  %v2340_v21 = vld [vmem:[#allocation2] sm:$0xff] (!%p2613_p12) }
 0x11f   : > { %v2246_v34 = vadd.f32 %v2245_v16, %v2244_v23  ;;  %v2267_v20 = vadd.f32 %v2266_v61, %v2265_v14  ;;  %v2288_v42 = vadd.f32 %v2287_v32, %v2286_v40  ;;  %v2309_v52 = vadd.f32 %v2308_v12, %v2307_v3  ;;  %v2614_v9 = vld [vmem:[%s5003_s5] ss:$0 sm:$0xff] (!%p2613_p12) }
 0x120   : > { %v2163_v18 = vrot.slane %v2162_v6, 1  ;;  %v2184_v51 = vrot.slane %v2183_v36, 1  ;;  %v2205_v30 = vrot.slane %v2204_v5, 1  ;;  %v2226_v22 = vrot.slane %v2225_v55, 1 }
 0x121   : > { %v2247_v31 = vrot.slane %v2246_v34, 1  ;;  %v2268_v54 = vrot.slane %v2267_v20, 1  ;;  %v2289_v46 = vrot.slane %v2288_v42, 1  ;;  %v2310_v10 = vrot.slane %v2309_v52, 1 }
 0x122   : > { %v2164_v19 = vadd.f32 %v2163_v18, %v2162_v6  ;;  %v2185_v41 = vadd.f32 %v2184_v51, %v2183_v36  ;;  %v2206_v28 = vadd.f32 %v2205_v30, %v2204_v5  ;;  %v2227_v24 = vadd.f32 %v2226_v22, %v2225_v55 }
 0x123   : > { %v2248_v53 = vadd.f32 %v2247_v31, %v2246_v34  ;;  %v2269_v45 = vadd.f32 %v2268_v54, %v2267_v20  ;;  %v2290_v29 = vadd.f32 %v2289_v46, %v2288_v42  ;;  %v2311_v49 = vadd.f32 %v2310_v10, %v2309_v52 }
 0x124   : > { %v2320_v11 = vsel %vm1870_vm0, %v2185_v41, %v2164_v19  ;;  %v3428_v35 = vmov (!%p2613_p12), 0   ;;  %v2335_v47 = vmax.f32 (!%p2613_p12), %v2334_v7, 1.0  ;;  %v2338_v60 = vmax.f32 (!%p2613_p12), %v2337_v1, 1.0 }
 0x125   : > { %v2321_v43 = vsel %vm1872_vm1, %v2206_v28, %v2320_v11  ;;  %3354 = vset.pattern.permute.xlu0 (!%p2613_p12), %v3428_v35  ;;  %v3429_v33 = vmov (!%p2613_p12), 0.0  }
 0x126   : > { %v2322_v15 = vsel %vm1874_vm2, %v2227_v24, %v2321_v43  ;;  %3274 = vmatprep.subr.bf16.mxu0 (!%p2613_p12), %v3429_v33  ;;  %3363 = vrcp.f32 (!%p2613_p12), %v2335_v47  ;;  %3290 = vmatprep.mubr.msk.bf16.mxu0 (!%p2613_p12), %vm3430_vm7, %v3429_v33 }
 0x127   : > { %v2323_v62 = vsel %vm1876_vm3, %v2248_v53, %v2322_v15  ;;  %2333 = sbr.rel (%p2613_p12) target bundleno = 813 (0x32d), region = 134  ;;  %3275 = vmatpush3.bf16.msra.mxu0 (!%p2613_p12), %v3355_v58  ;;  %3365 = vrcp.f32 (!%p2613_p12), %v2338_v60 }
 0x128   : > { %v2324_v39 = vsel %vm1878_vm4, %v2269_v45, %v2323_v62  ;;  %3276 = vmatprep.subr.bf16.mxu0 (!%p2613_p12), %v3429_v33 }
 0x129   : > { %v2325_v27 = vsel %vm1880_vm5, %v2290_v29, %v2324_v39 }
 0x12a   : > { %v2326_v44 = vsel %vm1882_vm6, %v2311_v49, %v2325_v27 }
 0x12b   : > { %v2328_v48 = vadd.f32 %v2326_v44, %v1887_v8  ;;  %3277 = vmatpush3.bf16.msra.mxu0 (!%p2613_p12), %v3356_v17 }
 0x12c   : > { %3278 = vmatprep.subr.bf16.mxu0 (!%p2613_p12), %v3429_v33 }
 0x12d   : > { %2329 = vst [vmem:[#allocation3] sm:$0xff] %v2328_v48 }
 0x12f   : > { %3279 = vmatpush3.bf16.msra.mxu0 %v3357_v57 }
 0x130   : > { %3280 = vmatprep.subr.bf16.mxu0 %v3429_v33  ;;  %v3364_v38 = vpop.eup %3363 }
 0x131   : > { %2343 = vperm.xlu0 %3354, %v3364_v38   ;;  %v3366_v0 = vpop.eup %3365 }
 0x133   : > { %3281 = vmatpush3.bf16.msra.mxu0 %v3358_v26 }
 0x134   : > { %3282 = vmatprep.subr.bf16.mxu0 %v3429_v33  ;;  %v2347_v2 = vld [vmem:[#allocation3] sm:$0xff] }
 0x135   : > { %2350 = vperm.xlu0 %3354, %v3366_v0  }
 0x137   : > { %3283 = vmatpush3.bf16.msra.mxu0 %v3359_v25 }
 0x138   : > { %3284 = vmatprep.subr.bf16.mxu0 %v3429_v33 }
 0x13b   : > { %3285 = vmatpush3.bf16.msra.mxu0 %v3360_v59 }
 0x13c   : > { %3286 = vmatprep.subr.bf16.mxu0 %v3429_v33 }
 0x13f   : > { %3287 = vmatpush3.bf16.msra.mxu0 %v3361_v4 }
 0x140   : > { %3288 = vmatprep.subr.bf16.mxu0 %v3429_v33 }
 0x143   : > { %3289 = vmatpush3.bf16.msra.mxu0 %v3362_v56 }
 0x1b0   : > { %v2344_v50 = vpop.permute.xlu0 %2343 }
 0x1b1   : > { %v2346_v14 = vmul.f32 %v2344_v50, %v2340_v21 }
 0x1b4   : > { %v2351_v23 = vpop.permute.xlu0 %2350 }
 0x1b5   : > { %v2353_v40 = vmul.f32 %v2351_v23, %v2347_v2 }
 0x1b7   : > { %v2354_v3 = vpack.c.bf16 %v2353_v40, %v2346_v14 }
 0x1b9   : > { %3291 = vmatmul.mubr.bf16.vlgmr.msra.gmra.mrb[0].mxu0 %v2354_v3 }
 0x28c   : > { %v2460_v63 = vpop.f32.mrb[0].mxu0 }
 0x28d   : > { %v2461_v37 = vadd.f32 %v2614_v9, %v2460_v63  ;;  %v3292_v13 = vpop.f32.mrb[1].mxu0 }
 0x28e   : > { %v2463_v16 = vpop.f32.mrb[2].mxu0 }
 0x28f   : > { %v2464_v61 = vadd.f32 %v2614_v9, %v2463_v16  ;;  %v3293_v32 = vpop.f32.mrb[3].mxu0  ;;  %3367 = vtanh.f32 %v2461_v37 }
 0x291   : > { %3369 = vtanh.f32 %v2464_v61 }
 0x299   : > { %v3368_v12 = vpop.eup %3367 }
 0x29b   : > { %v3370_v6 = vpop.eup %3369 }
 0x29c   : > { %v2469_v36 = vmul.f32 %v3370_v6, %v3368_v12 }
 0x29e   : > { %2470 = vadd.xlane.f32.xlu1 %v2469_v36 }
 0x32b   : > { %v2471_v5 = vpop.xlane.xlu1 %2470 }
 0x32c   : > { %2473 = vst.msk [vmem:[%s1429_s21] sm:$0xff] %vm2472_vm8, %v2471_v5 }
 0x32d PF: > { %s16_s27 = sadd.s32 1, %s3425_s27   ;;  %s5408_s21 = smov %s3405_s22 }
 0x32e   : > { %p13_p13 = scmp.ge.s32.totalorder %s16_s27, 6   ;;  %s5409_s22 = smov %s3521_s11 }
 0x32f   : > { %s5410_s23 = smov %s3417_s25  ;;  %s5411_s24 = smov %s3421_s26 }
 0x330   : > { %s5412_s25 = smov %s5415_s28  ;;  %s5413_s26 = smov %s5419_s29 }
 0x331   :  { %15 = sbr.rel (!%p13_p13) target bundleno = 4 (0x4), region = 183 }

</bundles_post_ra>
